<compile_context>
chip_gen: v7x
topology: tpu7x:2x2x1
jax: 0.10.0
libtpu: 0.0.40
codegen_flags: <defaults>
</compile_context>

<pallas_src>
import math
from functools import partial

import jax
import jax.numpy as jnp
from jax.experimental import pallas as pl
from jax.experimental.pallas import tpu as pltpu


# --------------------------- kernel ----------------------------------------
def _decoder_layer_kernel(n_heads, d_head, slope, fused_qkv, *refs):
    """One grid step == one (batch block, decoder layer).  The running hidden
    state is the output block itself: its BlockSpec maps every layer step to
    the same block, so it stays resident in VMEM across the sequential
    ("arbitrary") layer axis."""
    if fused_qkv:
        (h0_ref, wqkv_ref, bqkv_ref, wo_ref, bo_ref,
         ln_g_ref, ln_b_ref, w1_ref, b1_ref, w2_ref, b2_ref, out_ref) = refs
    else:
        (h0_ref, wq_ref, bq_ref, wk_ref, bk_ref, wv_ref, bv_ref, wo_ref, bo_ref,
         ln_g_ref, ln_b_ref, w1_ref, b1_ref, w2_ref, b2_ref, out_ref) = refs

    layer = pl.program_id(1)

    @pl.when(layer == 0)
    def _():
        out_ref[...] = h0_ref[...]          # initial state = x + pos (from wrapper)

    bt, seq, d_model = out_ref.shape
    nhd = n_heads * d_head
    m = bt * seq

    h = out_ref[...]                        # (Bt, seq, d_model) f32
    h2d = h.reshape(m, d_model)             # flatten batch block into matmul M
    h_bf = h2d.astype(jnp.bfloat16)

    # ---------------- MultiHeadAttention: ln(x + W_o @ attn(x)) -------------
    if fused_qkv:
        # nhd % 128 == 0 -> one fused matmul, 128-aligned result slices.
        qkv = jnp.dot(h_bf, wqkv_ref[0], preferred_element_type=jnp.float32) + bqkv_ref[0]
        q = qkv[:, 0 * nhd:1 * nhd]
        k = qkv[:, 1 * nhd:2 * nhd]
        v = qkv[:, 2 * nhd:3 * nhd]
    else:
        q = jnp.dot(h_bf, wq_ref[0], preferred_element_type=jnp.float32) + bq_ref[0]
        k = jnp.dot(h_bf, wk_ref[0], preferred_element_type=jnp.float32) + bk_ref[0]
        v = jnp.dot(h_bf, wv_ref[0], preferred_element_type=jnp.float32) + bv_ref[0]

    def to_heads(t):
        # (Bt*seq, nhd) f32 -> (Bt*n_heads, seq, d_head) bf16: one relayout,
        # no per-head lane slicing.
        t = t.reshape(bt, seq, n_heads, d_head)
        t = jnp.transpose(t, (0, 2, 1, 3)).reshape(bt * n_heads, seq, d_head)
        return t.astype(jnp.bfloat16)

    qh, kh, vh = to_heads(q), to_heads(k), to_heads(v)

    scale = 1.0 / math.sqrt(d_head)
    scores = jnp.einsum('gqd,gkd->gqk', qh, kh,
                        preferred_element_type=jnp.float32) * scale
    scores = scores - jnp.max(scores, axis=-1, keepdims=True)
    e = jnp.exp(scores)
    probs = e * pl.reciprocal(jnp.sum(e, axis=-1, keepdims=True), approx=True)

    ctx = jnp.einsum('gqk,gkd->gqd', probs.astype(jnp.bfloat16), vh,
                     preferred_element_type=jnp.float32)   # (Bt*nh, seq, d_head)
    ctx = ctx.reshape(bt, n_heads, seq, d_head)
    ctx = jnp.transpose(ctx, (0, 2, 1, 3)).reshape(m, nhd)  # concat heads

    attn = jnp.dot(ctx.astype(jnp.bfloat16), wo_ref[0],
                   preferred_element_type=jnp.float32) + bo_ref[0]

    res = h2d + attn
    # LayerNorm over d_model (eps = 1e-5, PyTorch default) — f32 math.
    mu = jnp.mean(res, axis=-1, keepdims=True)
    var = jnp.mean((res - mu) ** 2, axis=-1, keepdims=True)
    normed = (res - mu) * jax.lax.rsqrt(var + 1e-5)
    h2 = normed * ln_g_ref[0] + ln_b_ref[0]

    # ------------- feed-forward: Linear -> RLReLU -> Linear, + residual -----
    ff1 = jnp.dot(h2.astype(jnp.bfloat16), w1_ref[0],
                  preferred_element_type=jnp.float32) + b1_ref[0]
    # RLReLU: leaky part here; the "+ rectifier" constant is folded into
    # b_ff2 at parameter-preparation time (mathematically exact in f32).
    act = jnp.maximum(ff1, slope * ff1)
    ff2 = jnp.dot(act.astype(jnp.bfloat16), w2_ref[0],
                  preferred_element_type=jnp.float32) + b2_ref[0]

    out_ref[...] = (h2 + ff2).reshape(bt, seq, d_model)      # MergeLayer residual


# --------------------------- parameter prep (one-time) ----------------------
def prepare_params(params, n_heads, d_head, slope=0.01):
    """One-time kernel-ready parameter prep: bf16 weight cast, QKV split (or
    keep fused when aligned), RLReLU rectifier folded into b_ff2.  Done ONCE
    at load time so no extra HBM traffic per forward call."""
    nhd = n_heads * d_head
    rect = -(1.0 - slope) / math.sqrt(2.0 * math.pi)
    fused = (nhd % 128 == 0)

    p = dict(
        pos_table=params['pos_table'].astype(jnp.float32),
        w_out=params['w_out'].astype(jnp.bfloat16),
        b_out=params['b_out'].astype(jnp.float32),
        ln_g=params['ln_g'].astype(jnp.float32),
        ln_b=params['ln_b'].astype(jnp.float32),
        w_ff1=params['w_ff1'].astype(jnp.bfloat16),
        b_ff1=params['b_ff1'].astype(jnp.float32),
        w_ff2=params['w_ff2'].astype(jnp.bfloat16),
        # (act + rect) @ W2 + b2  ==  act @ W2 + (b2 + rect * sum_k W2[k, :])
        b_ff2=(params['b_ff2']
               + rect * jnp.sum(params['w_ff2'], axis=1, keepdims=True)
               ).astype(jnp.float32),
    )
    if fused:
        p['w_qkv'] = params['w_qkv'].astype(jnp.bfloat16)
        p['b_qkv'] = params['b_qkv'].astype(jnp.float32)
    else:
        w_qkv, b_qkv = params['w_qkv'], params['b_qkv']
        p['w_q'] = w_qkv[:, :, 0 * nhd:1 * nhd].astype(jnp.bfloat16)
        p['w_k'] = w_qkv[:, :, 1 * nhd:2 * nhd].astype(jnp.bfloat16)
        p['w_v'] = w_qkv[:, :, 2 * nhd:3 * nhd].astype(jnp.bfloat16)
        p['b_q'] = b_qkv[:, :, 0 * nhd:1 * nhd].astype(jnp.float32)
        p['b_k'] = b_qkv[:, :, 1 * nhd:2 * nhd].astype(jnp.float32)
        p['b_v'] = b_qkv[:, :, 2 * nhd:3 * nhd].astype(jnp.float32)
    return p


# --------------------------- wrapper ----------------------------------------
def transformer_pallas(x, p, n_heads, d_head, *, block_bs=None, slope=0.01):
    bs, seq, d_model = x.shape
    nhd = n_heads * d_head
    fused = 'w_qkv' in p
    n_layers = (p['w_qkv'] if fused else p['w_q']).shape[0]
    d_inner = p['w_ff1'].shape[-1]

    # x + positional encoding on the XLA side (drop_emb p=0 -> identity).
    h0 = (x + p['pos_table'][:seq][None]).astype(jnp.float32)

    # ---- batch-block size from a rough VMEM estimate ------------------------
    def est_bytes(bt):
        m = bt * seq
        # double-buffered bf16 weight blocks + f32 biases/ln
        w_bytes = 2 * 2 * (3 * d_model * nhd + nhd * d_model
                           + d_model * d_inner + d_inner * d_model)
        b_bytes = 2 * 4 * (3 * nhd + 4 * d_model + d_inner)
        # h0 + out f32 blocks (double buffered)
        io_bytes = 4 * 4 * bt * seq * d_model
        # largest live intermediates (q/k/v, scores, ffn) in f32
        inter = 4 * (3 * m * nhd + bt * n_heads * seq * seq
                     + 2 * m * d_inner + 4 * m * d_model)
        return w_bytes + b_bytes + io_bytes + inter

    budget = 40 * 1024 * 1024                     # conservative for v7x's 64 MiB
    if block_bs is None:
        block_bs = 1
        for cand in range(bs, 0, -1):
            if bs % cand == 0 and est_bytes(cand) <= budget:
                block_bs = cand
                break
    bt = block_bs
    assert bs % bt == 0, "block_bs must divide the batch size"

    vmem_limit = int(min(max(2 * est_bytes(bt), 32 * 1024 * 1024),
                         64 * 1024 * 1024))

    if fused:
        qkv_args = (p['w_qkv'], p['b_qkv'])
    else:
        qkv_args = (p['w_q'], p['b_q'], p['w_k'], p['b_k'], p['w_v'], p['b_v'])

    args = (h0,) + qkv_args + (p['w_out'], p['b_out'], p['ln_g'], p['ln_b'],
                               p['w_ff1'], p['b_ff1'], p['w_ff2'], p['b_ff2'])

    def batch_spec(arr):
        return pl.BlockSpec((bt,) + arr.shape[1:], lambda b, l: (b, 0, 0))

    def layer_spec(arr):
        return pl.BlockSpec((1,) + arr.shape[1:], lambda b, l: (l, 0, 0))

    in_specs = [batch_spec(h0)] + [layer_spec(a) for a in args[1:]]

    kernel = partial(_decoder_layer_kernel, n_heads, d_head, slope, fused)
    return pl.pallas_call(
        kernel,
        out_shape=jax.ShapeDtypeStruct((bs, seq, d_model), jnp.float32),
        grid_spec=pltpu.PrefetchScalarGridSpec(
            num_scalar_prefetch=0,
            grid=(bs // bt, n_layers),
            in_specs=in_specs,
            out_specs=pl.BlockSpec((bt, seq, d_model), lambda b, l: (b, 0, 0)),
        ),
        # h0 shares the output HBM buffer (same block spec, constant along the
        # layer axis) -> no redundant output allocation.
        input_output_aliases={0: 0},
        compiler_params=pltpu.CompilerParams(
            # batch-block axis is independent (shardable across v7x's 2 TCs);
            # layer axis is sequential (output block = running hidden state).
            dimension_semantics=("parallel", "arbitrary"),
            vmem_limit_bytes=vmem_limit),
    )(*args)


# ------------------------- pure-JAX reference -------------------------------
def transformer_ref(x, params, n_heads, d_head):
    seq = x.shape[1]
    h = x + params['pos_table'][:seq][None]
    n_layers = params['w_qkv'].shape[0]
    nhd = n_heads * d_head
    for l in range(n_layers):
        qkv = h @ params['w_qkv'][l] + params['b_qkv'][l, 0]
        q, k, v = qkv[..., :nhd], qkv[..., nhd:2 * nhd], qkv[..., 2 * nhd:]
        bs, s, _ = h.shape
        qh = q.reshape(bs, s, n_heads, d_head).transpose(0, 2, 1, 3)
        kh = k.reshape(bs, s, n_heads, d_head).transpose(0, 2, 1, 3)
        vh = v.reshape(bs, s, n_heads, d_head).transpose(0, 2, 1, 3)
        scores = jnp.einsum('bhqd,bhkd->bhqk', qh, kh) / math.sqrt(d_head)
        probs = jax.nn.softmax(scores, axis=-1)
        av = jnp.einsum('bhqk,bhkd->bhqd', probs, vh)
        av = av.transpose(0, 2, 1, 3).reshape(bs, s, nhd)
        attn_out = av @ params['w_out'][l] + params['b_out'][l, 0]
        res = h + attn_out
        mu = res.mean(-1, keepdims=True)
        var = ((res - mu) ** 2).mean(-1, keepdims=True)
        normed = (res - mu) / jnp.sqrt(var + 1e-5)
        h2 = normed * params['ln_g'][l, 0] + params['ln_b'][l, 0]
        ff1 = h2 @ params['w_ff1'][l] + params['b_ff1'][l, 0]
        slope = 0.01
        rect = -(1.0 - slope) / math.sqrt(2.0 * math.pi)
        act = jnp.where(ff1 >= 0, ff1, slope * ff1) + rect        # RLReLU
        ff2 = act @ params['w_ff2'][l] + params['b_ff2'][l, 0]
        h = h2 + ff2
    return h


# ------------------------- deterministic params -----------------------------
def init_params(key, n_layers, ctx_len, n_heads, d_model, d_head, d_inner):
    nhd = n_heads * d_head
    ks = jax.random.split(key, 9)

    def lin(k, fan_in, shape):
        bound = 1.0 / math.sqrt(fan_in)
        return jax.random.uniform(k, shape, jnp.float32, -bound, bound)

    return dict(
        pos_table=jax.random.normal(ks[0], (ctx_len, d_model), jnp.float32),
        w_qkv=lin(ks[1], d_model, (n_layers, d_model, 3 * nhd)),
        b_qkv=lin(ks[2], d_model, (n_layers, 1, 3 * nhd)),
        w_out=lin(ks[3], nhd, (n_layers, nhd, d_model)),
        b_out=lin(ks[4], nhd, (n_layers, 1, d_model)),
        ln_g=jnp.ones((n_layers, 1, d_model), jnp.float32),
        ln_b=jnp.zeros((n_layers, 1, d_model), jnp.float32),
        w_ff1=lin(ks[5], d_model, (n_layers, d_model, d_inner)),
        b_ff1=lin(ks[6], d_model, (n_layers, 1, d_inner)),
        w_ff2=lin(ks[7], d_inner, (n_layers, d_inner, d_model)),
        b_ff2=lin(ks[8], d_inner, (n_layers, 1, d_model)),
    )


if __name__ == "__main__":
    bs, seq, d_model = 2, 8, 32
    ctx_len, n_layers, n_heads, d_head, d_inner = 16, 2, 4, 8, 64

    key = jax.random.PRNGKey(0)
    kx, kp = jax.random.split(key)
    x = jax.random.normal(kx, (bs, seq, d_model), jnp.float32)
    params = init_params(kp, n_layers, ctx_len, n_heads, d_model, d_head, d_inner)

    prepared = prepare_params(params, n_heads, d_head)   # one-time bf16 / split / fold
    out = transformer_pallas(x, prepared, n_heads, d_head)
    out = jax.block_until_ready(out)

    ref = transformer_ref(x, params, n_heads, d_head)
    err = float(jnp.max(jnp.abs(out - ref)))
    # bf16 matmuls + approx reciprocal -> looser tolerance than pure f32.
    assert jnp.allclose(out, ref, rtol=5e-2, atol=5e-2), f"max abs err {err}"
    print("KERNEL_OK")
</pallas_src>

<mosaic_0001>
module attributes {stable_mosaic.version = 11 : i64} {
  func.func @_decoder_layer_kernel(%arg0: i32, %arg1: i32, %arg2: memref<2x8x32xf32, #tpu.memory_space<vmem>>, %arg3: memref<1x32x32xbf16, #tpu.memory_space<vmem>>, %arg4: memref<1x1x32xf32, #tpu.memory_space<vmem>>, %arg5: memref<1x32x32xbf16, #tpu.memory_space<vmem>>, %arg6: memref<1x1x32xf32, #tpu.memory_space<vmem>>, %arg7: memref<1x32x32xbf16, #tpu.memory_space<vmem>>, %arg8: memref<1x1x32xf32, #tpu.memory_space<vmem>>, %arg9: memref<1x32x32xbf16, #tpu.memory_space<vmem>>, %arg10: memref<1x1x32xf32, #tpu.memory_space<vmem>>, %arg11: memref<1x1x32xf32, #tpu.memory_space<vmem>>, %arg12: memref<1x1x32xf32, #tpu.memory_space<vmem>>, %arg13: memref<1x32x64xbf16, #tpu.memory_space<vmem>>, %arg14: memref<1x1x64xf32, #tpu.memory_space<vmem>>, %arg15: memref<1x64x32xbf16, #tpu.memory_space<vmem>>, %arg16: memref<1x1x32xf32, #tpu.memory_space<vmem>>, %arg17: memref<2x8x32xf32, #tpu.memory_space<vmem>>) attributes {dimension_semantics = [#tpu.dimension_semantics<parallel>, #tpu.dimension_semantics<arbitrary>], iteration_bounds = array<i64: 1, 2>, scalar_prefetch = 0 : i64, scratch_operands = 0 : i64, tpu.core_type = #tpu.core_type<tc>, window_params = [{transform_indices = @transform_0, window_bounds = array<i64: 2, 8, 32>}, {transform_indices = @transform_1, window_bounds = array<i64: 1, 32, 32>}, {transform_indices = @transform_2, window_bounds = array<i64: 1, 1, 32>}, {transform_indices = @transform_3, window_bounds = array<i64: 1, 32, 32>}, {transform_indices = @transform_4, window_bounds = array<i64: 1, 1, 32>}, {transform_indices = @transform_5, window_bounds = array<i64: 1, 32, 32>}, {transform_indices = @transform_6, window_bounds = array<i64: 1, 1, 32>}, {transform_indices = @transform_7, window_bounds = array<i64: 1, 32, 32>}, {transform_indices = @transform_8, window_bounds = array<i64: 1, 1, 32>}, {transform_indices = @transform_9, window_bounds = array<i64: 1, 1, 32>}, {transform_indices = @transform_10, window_bounds = array<i64: 1, 1, 32>}, {transform_indices = @transform_11, window_bounds = array<i64: 1, 32, 64>}, {transform_indices = @transform_12, window_bounds = array<i64: 1, 1, 64>}, {transform_indices = @transform_13, window_bounds = array<i64: 1, 64, 32>}, {transform_indices = @transform_14, window_bounds = array<i64: 1, 1, 32>}, {transform_indices = @transform_15, window_bounds = array<i64: 2, 8, 32>}]} {
    %c0_i32 = arith.constant 0 : i32
    %0 = arith.cmpi eq, %arg1, %c0_i32 : i32
    %1 = arith.extui %0 : i1 to i32
    %c0_i32_0 = arith.constant 0 : i32
    %2 = arith.cmpi ne, %1, %c0_i32_0 : i32
    scf.if %2 {
      %c0_64 = arith.constant 0 : index
      %c0_65 = arith.constant 0 : index
      %c0_66 = arith.constant 0 : index
      %114 = vector.load %arg2[%c0_64, %c0_65, %c0_66] : memref<2x8x32xf32, #tpu.memory_space<vmem>>, vector<2x8x32xf32>
      %c0_67 = arith.constant 0 : index
      %c0_68 = arith.constant 0 : index
      %c0_69 = arith.constant 0 : index
      %115 = vector.load %arg17[%c0_67, %c0_68, %c0_69] : memref<2x8x32xf32, #tpu.memory_space<vmem>>, vector<2x8x32xf32>
      tpu.vector_store %arg17[%c0_67, %c0_68, %c0_69], %114 {strides = array<i32>} : memref<2x8x32xf32, #tpu.memory_space<vmem>>, vector<2x8x32xf32>,
    } else {
    }
    %c0 = arith.constant 0 : index
    %c0_1 = arith.constant 0 : index
    %c0_2 = arith.constant 0 : index
    %3 = vector.load %arg17[%c0, %c0_1, %c0_2] : memref<2x8x32xf32, #tpu.memory_space<vmem>>, vector<2x8x32xf32>
    %4 = vector.shape_cast %3 : vector<2x8x32xf32> to vector<16x32xf32>
    %5 = arith.truncf %4 : vector<16x32xf32> to vector<16x32xbf16>
    %c0_3 = arith.constant 0 : index
    %c0_4 = arith.constant 0 : index
    %c0_5 = arith.constant 0 : index
    %6 = vector.load %arg3[%c0_3, %c0_4, %c0_5] : memref<1x32x32xbf16, #tpu.memory_space<vmem>>, vector<1x32x32xbf16>
    %7 = vector.shape_cast %6 : vector<1x32x32xbf16> to vector<32x32xbf16>
    %cst = arith.constant dense<0.000000e+00> : vector<16x32xf32>
    %8 = tpu.matmul %5, %7, %cst {dimension_numbers = #tpu.dot_dimension_numbers<[1], [0], [0], [1], [0, 0, 1, 1], [], []>} : vector<16x32xbf16>, vector<32x32xbf16>, vector<16x32xf32> -> vector<16x32xf32>
    %c0_6 = arith.constant 0 : index
    %c0_7 = arith.constant 0 : index
    %c0_8 = arith.constant 0 : index
    %9 = vector.load %arg4[%c0_6, %c0_7, %c0_8] : memref<1x1x32xf32, #tpu.memory_space<vmem>>, vector<1x1x32xf32>
    %10 = vector.shape_cast %9 : vector<1x1x32xf32> to vector<1x32xf32>
    %11 = vector.broadcast %10 : vector<1x32xf32> to vector<16x32xf32>
    %12 = arith.addf %8, %11 : vector<16x32xf32>
    %c0_9 = arith.constant 0 : index
    %c0_10 = arith.constant 0 : index
    %c0_11 = arith.constant 0 : index
    %13 = vector.load %arg5[%c0_9, %c0_10, %c0_11] : memref<1x32x32xbf16, #tpu.memory_space<vmem>>, vector<1x32x32xbf16>
    %14 = vector.shape_cast %13 : vector<1x32x32xbf16> to vector<32x32xbf16>
    %cst_12 = arith.constant dense<0.000000e+00> : vector<16x32xf32>
    %15 = tpu.matmul %5, %14, %cst_12 {dimension_numbers = #tpu.dot_dimension_numbers<[1], [0], [0], [1], [0, 0, 1, 1], [], []>} : vector<16x32xbf16>, vector<32x32xbf16>, vector<16x32xf32> -> vector<16x32xf32>
    %c0_13 = arith.constant 0 : index
    %c0_14 = arith.constant 0 : index
    %c0_15 = arith.constant 0 : index
    %16 = vector.load %arg6[%c0_13, %c0_14, %c0_15] : memref<1x1x32xf32, #tpu.memory_space<vmem>>, vector<1x1x32xf32>
    %17 = vector.shape_cast %16 : vector<1x1x32xf32> to vector<1x32xf32>
    %18 = vector.broadcast %17 : vector<1x32xf32> to vector<16x32xf32>
    %19 = arith.addf %15, %18 : vector<16x32xf32>
    %c0_16 = arith.constant 0 : index
    %c0_17 = arith.constant 0 : index
    %c0_18 = arith.constant 0 : index
    %20 = vector.load %arg7[%c0_16, %c0_17, %c0_18] : memref<1x32x32xbf16, #tpu.memory_space<vmem>>, vector<1x32x32xbf16>
    %21 = vector.shape_cast %20 : vector<1x32x32xbf16> to vector<32x32xbf16>
    %cst_19 = arith.constant dense<0.000000e+00> : vector<16x32xf32>
    %22 = tpu.matmul %5, %21, %cst_19 {dimension_numbers = #tpu.dot_dimension_numbers<[1], [0], [0], [1], [0, 0, 1, 1], [], []>} : vector<16x32xbf16>, vector<32x32xbf16>, vector<16x32xf32> -> vector<16x32xf32>
    %c0_20 = arith.constant 0 : index
    %c0_21 = arith.constant 0 : index
    %c0_22 = arith.constant 0 : index
    %23 = vector.load %arg8[%c0_20, %c0_21, %c0_22] : memref<1x1x32xf32, #tpu.memory_space<vmem>>, vector<1x1x32xf32>
    %24 = vector.shape_cast %23 : vector<1x1x32xf32> to vector<1x32xf32>
    %25 = vector.broadcast %24 : vector<1x32xf32> to vector<16x32xf32>
    %26 = arith.addf %22, %25 : vector<16x32xf32>
    %27 = vector.shape_cast %12 : vector<16x32xf32> to vector<2x8x4x8xf32>
    %28 = tpu.transpose %27, [0, 2, 1, 3] : vector<2x8x4x8xf32> -> vector<2x4x8x8xf32>
    %29 = vector.shape_cast %28 : vector<2x4x8x8xf32> to vector<8x8x8xf32>
    %30 = arith.truncf %29 : vector<8x8x8xf32> to vector<8x8x8xbf16>
    %31 = vector.shape_cast %19 : vector<16x32xf32> to vector<2x8x4x8xf32>
    %32 = tpu.transpose %31, [0, 2, 1, 3] : vector<2x8x4x8xf32> -> vector<2x4x8x8xf32>
    %33 = vector.shape_cast %32 : vector<2x4x8x8xf32> to vector<8x8x8xf32>
    %34 = arith.truncf %33 : vector<8x8x8xf32> to vector<8x8x8xbf16>
    %35 = vector.shape_cast %26 : vector<16x32xf32> to vector<2x8x4x8xf32>
    %36 = tpu.transpose %35, [0, 2, 1, 3] : vector<2x8x4x8xf32> -> vector<2x4x8x8xf32>
    %37 = vector.shape_cast %36 : vector<2x4x8x8xf32> to vector<8x8x8xf32>
    %38 = arith.truncf %37 : vector<8x8x8xf32> to vector<8x8x8xbf16>
    "tpu.trace_start"() <{level = 10 : i32, message = "gqd,gkd->gqk"}> : () -> ()
    %cst_23 = arith.constant dense<0.000000e+00> : vector<8x8x8xf32>
    %39 = tpu.matmul %30, %34, %cst_23 {dimension_numbers = #tpu.dot_dimension_numbers<[2], [2], [1], [1], [0, 0, 0, 1, 1, 1], [0], [0]>} : vector<8x8x8xbf16>, vector<8x8x8xbf16>, vector<8x8x8xf32> -> vector<8x8x8xf32>
    "tpu.trace_stop"() : () -> ()
    %cst_24 = arith.constant 0.353553385 : f32
    %40 = vector.broadcast %cst_24 : f32 to vector<8x8x8xf32>
    %41 = arith.mulf %39, %40 : vector<8x8x8xf32>
    %cst_25 = arith.constant dense<0xFF800000> : vector<8x8xf32>
    %42 = vector.multi_reduction <maximumf>, %41, %cst_25 [2] : vector<8x8x8xf32> to vector<8x8xf32>
    %43 = vector.shape_cast %42 : vector<8x8xf32> to vector<8x8x1xf32>
    %44 = vector.broadcast %43 : vector<8x8x1xf32> to vector<8x8x8xf32>
    %45 = arith.subf %41, %44 : vector<8x8x8xf32>
    %46 = math.exp %45 : vector<8x8x8xf32>
    %cst_26 = arith.constant dense<0.000000e+00> : vector<8x8xf32>
    %47 = vector.multi_reduction <add>, %46, %cst_26 [2] : vector<8x8x8xf32> to vector<8x8xf32>
    %48 = vector.shape_cast %47 : vector<8x8xf32> to vector<8x8x1xf32>
    %49 = tpu.reciprocal %48 {approx = true} : vector<8x8x1xf32> -> vector<8x8x1xf32>
    %50 = vector.broadcast %49 : vector<8x8x1xf32> to vector<8x8x8xf32>
    %51 = arith.mulf %46, %50 : vector<8x8x8xf32>
    %52 = arith.truncf %51 : vector<8x8x8xf32> to vector<8x8x8xbf16>
    "tpu.trace_start"() <{level = 10 : i32, message = "gqk,gkd->gqd"}> : () -> ()
    %cst_27 = arith.constant dense<0.000000e+00> : vector<8x8x8xf32>
    %53 = tpu.matmul %52, %38, %cst_27 {dimension_numbers = #tpu.dot_dimension_numbers<[2], [1], [1], [2], [0, 0, 0, 1, 1, 2], [0], [0]>} : vector<8x8x8xbf16>, vector<8x8x8xbf16>, vector<8x8x8xf32> -> vector<8x8x8xf32>
    "tpu.trace_stop"() : () -> ()
    %54 = vector.shape_cast %53 : vector<8x8x8xf32> to vector<2x4x8x8xf32>
    %55 = tpu.transpose %54, [0, 2, 1, 3] : vector<2x4x8x8xf32> -> vector<2x8x4x8xf32>
    %56 = vector.shape_cast %55 : vector<2x8x4x8xf32> to vector<16x32xf32>
    %57 = arith.truncf %56 : vector<16x32xf32> to vector<16x32xbf16>
    %c0_28 = arith.constant 0 : index
    %c0_29 = arith.constant 0 : index
    %c0_30 = arith.constant 0 : index
    %58 = vector.load %arg9[%c0_28, %c0_29, %c0_30] : memref<1x32x32xbf16, #tpu.memory_space<vmem>>, vector<1x32x32xbf16>
    %59 = vector.shape_cast %58 : vector<1x32x32xbf16> to vector<32x32xbf16>
    %cst_31 = arith.constant dense<0.000000e+00> : vector<16x32xf32>
    %60 = tpu.matmul %57, %59, %cst_31 {dimension_numbers = #tpu.dot_dimension_numbers<[1], [0], [0], [1], [0, 0, 1, 1], [], []>} : vector<16x32xbf16>, vector<32x32xbf16>, vector<16x32xf32> -> vector<16x32xf32>
    %c0_32 = arith.constant 0 : index
    %c0_33 = arith.constant 0 : index
    %c0_34 = arith.constant 0 : index
    %61 = vector.load %arg10[%c0_32, %c0_33, %c0_34] : memref<1x1x32xf32, #tpu.memory_space<vmem>>, vector<1x1x32xf32>
    %62 = vector.shape_cast %61 : vector<1x1x32xf32> to vector<1x32xf32>
    %63 = vector.broadcast %62 : vector<1x32xf32> to vector<16x32xf32>
    %64 = arith.addf %60, %63 : vector<16x32xf32>
    %65 = arith.addf %4, %64 : vector<16x32xf32>
    %cst_35 = arith.constant dense<0.000000e+00> : vector<16xf32>
    %66 = vector.multi_reduction <add>, %65, %cst_35 [1] : vector<16x32xf32> to vector<16xf32>
    %67 = vector.shape_cast %66 : vector<16xf32> to vector<16x1xf32>
    %cst_36 = arith.constant 3.200000e+01 : f32
    %68 = vector.broadcast %cst_36 : f32 to vector<16x1xf32>
    %69 = arith.divf %67, %68 : vector<16x1xf32>
    %70 = vector.broadcast %69 : vector<16x1xf32> to vector<16x32xf32>
    %71 = arith.subf %65, %70 : vector<16x32xf32>
    %72 = arith.mulf %71, %71 : vector<16x32xf32>
    %cst_37 = arith.constant dense<0.000000e+00> : vector<16xf32>
    %73 = vector.multi_reduction <add>, %72, %cst_37 [1] : vector<16x32xf32> to vector<16xf32>
    %74 = vector.shape_cast %73 : vector<16xf32> to vector<16x1xf32>
    %cst_38 = arith.constant 3.200000e+01 : f32
    %75 = vector.broadcast %cst_38 : f32 to vector<16x1xf32>
    %76 = arith.divf %74, %75 : vector<16x1xf32>
    %77 = vector.broadcast %69 : vector<16x1xf32> to vector<16x32xf32>
    %78 = arith.subf %65, %77 : vector<16x32xf32>
    %cst_39 = arith.constant 9.99999974E-6 : f32
    %79 = vector.broadcast %cst_39 : f32 to vector<16x1xf32>
    %80 = arith.addf %76, %79 : vector<16x1xf32>
    %81 = math.rsqrt %80 : vector<16x1xf32>
    %82 = vector.broadcast %81 : vector<16x1xf32> to vector<16x32xf32>
    %83 = arith.mulf %78, %82 : vector<16x32xf32>
    %c0_40 = arith.constant 0 : index
    %c0_41 = arith.constant 0 : index
    %c0_42 = arith.constant 0 : index
    %84 = vector.load %arg11[%c0_40, %c0_41, %c0_42] : memref<1x1x32xf32, #tpu.memory_space<vmem>>, vector<1x1x32xf32>
    %85 = vector.shape_cast %84 : vector<1x1x32xf32> to vector<1x32xf32>
    %86 = vector.broadcast %85 : vector<1x32xf32> to vector<16x32xf32>
    %87 = arith.mulf %83, %86 : vector<16x32xf32>
    %c0_43 = arith.constant 0 : index
    %c0_44 = arith.constant 0 : index
    %c0_45 = arith.constant 0 : index
    %88 = vector.load %arg12[%c0_43, %c0_44, %c0_45] : memref<1x1x32xf32, #tpu.memory_space<vmem>>, vector<1x1x32xf32>
    %89 = vector.shape_cast %88 : vector<1x1x32xf32> to vector<1x32xf32>
    %90 = vector.broadcast %89 : vector<1x32xf32> to vector<16x32xf32>
    %91 = arith.addf %87, %90 : vector<16x32xf32>
    %92 = arith.truncf %91 : vector<16x32xf32> to vector<16x32xbf16>
    %c0_46 = arith.constant 0 : index
    %c0_47 = arith.constant 0 : index
    %c0_48 = arith.constant 0 : index
    %93 = vector.load %arg13[%c0_46, %c0_47, %c0_48] : memref<1x32x64xbf16, #tpu.memory_space<vmem>>, vector<1x32x64xbf16>
    %94 = vector.shape_cast %93 : vector<1x32x64xbf16> to vector<32x64xbf16>
    %cst_49 = arith.constant dense<0.000000e+00> : vector<16x64xf32>
    %95 = tpu.matmul %92, %94, %cst_49 {dimension_numbers = #tpu.dot_dimension_numbers<[1], [0], [0], [1], [0, 0, 1, 1], [], []>} : vector<16x32xbf16>, vector<32x64xbf16>, vector<16x64xf32> -> vector<16x64xf32>
    %c0_50 = arith.constant 0 : index
    %c0_51 = arith.constant 0 : index
    %c0_52 = arith.constant 0 : index
    %96 = vector.load %arg14[%c0_50, %c0_51, %c0_52] : memref<1x1x64xf32, #tpu.memory_space<vmem>>, vector<1x1x64xf32>
    %97 = vector.shape_cast %96 : vector<1x1x64xf32> to vector<1x64xf32>
    %98 = vector.broadcast %97 : vector<1x64xf32> to vector<16x64xf32>
    %99 = arith.addf %95, %98 : vector<16x64xf32>
    %cst_53 = arith.constant 0.00999999977 : f32
    %100 = vector.broadcast %cst_53 : f32 to vector<16x64xf32>
    %101 = arith.mulf %100, %99 : vector<16x64xf32>
    %102 = arith.maximumf %99, %101 : vector<16x64xf32>
    %103 = arith.truncf %102 : vector<16x64xf32> to vector<16x64xbf16>
    %c0_54 = arith.constant 0 : index
    %c0_55 = arith.constant 0 : index
    %c0_56 = arith.constant 0 : index
    %104 = vector.load %arg15[%c0_54, %c0_55, %c0_56] : memref<1x64x32xbf16, #tpu.memory_space<vmem>>, vector<1x64x32xbf16>
    %105 = vector.shape_cast %104 : vector<1x64x32xbf16> to vector<64x32xbf16>
    %cst_57 = arith.constant dense<0.000000e+00> : vector<16x32xf32>
    %106 = tpu.matmul %103, %105, %cst_57 {dimension_numbers = #tpu.dot_dimension_numbers<[1], [0], [0], [1], [0, 0, 1, 1], [], []>} : vector<16x64xbf16>, vector<64x32xbf16>, vector<16x32xf32> -> vector<16x32xf32>
    %c0_58 = arith.constant 0 : index
    %c0_59 = arith.constant 0 : index
    %c0_60 = arith.constant 0 : index
    %107 = vector.load %arg16[%c0_58, %c0_59, %c0_60] : memref<1x1x32xf32, #tpu.memory_space<vmem>>, vector<1x1x32xf32>
    %108 = vector.shape_cast %107 : vector<1x1x32xf32> to vector<1x32xf32>
    %109 = vector.broadcast %108 : vector<1x32xf32> to vector<16x32xf32>
    %110 = arith.addf %106, %109 : vector<16x32xf32>
    %111 = arith.addf %91, %110 : vector<16x32xf32>
    %112 = vector.shape_cast %111 : vector<16x32xf32> to vector<2x8x32xf32>
    %c0_61 = arith.constant 0 : index
    %c0_62 = arith.constant 0 : index
    %c0_63 = arith.constant 0 : index
    %113 = vector.load %arg17[%c0_61, %c0_62, %c0_63] : memref<2x8x32xf32, #tpu.memory_space<vmem>>, vector<2x8x32xf32>
    tpu.vector_store %arg17[%c0_61, %c0_62, %c0_63], %112 {strides = array<i32>} : memref<2x8x32xf32, #tpu.memory_space<vmem>>, vector<2x8x32xf32>,
    return
  }
  func.func @transform_0(%arg0: i32, %arg1: i32) -> (i32, i32, i32) {
    %c0_i32 = arith.constant 0 : i32
    %c0_i32_0 = arith.constant 0 : i32
    %c0_i32_1 = arith.constant 0 : i32
    return %arg0, %c0_i32, %c0_i32_0 : i32, i32, i32
  }
  func.func @transform_1(%arg0: i32, %arg1: i32) -> (i32, i32, i32) {
    %c0_i32 = arith.constant 0 : i32
    %c0_i32_0 = arith.constant 0 : i32
    %c0_i32_1 = arith.constant 0 : i32
    return %arg1, %c0_i32, %c0_i32_0 : i32, i32, i32
  }
  func.func @transform_2(%arg0: i32, %arg1: i32) -> (i32, i32, i32) {
    %c0_i32 = arith.constant 0 : i32
    %c0_i32_0 = arith.constant 0 : i32
    %c0_i32_1 = arith.constant 0 : i32
    return %arg1, %c0_i32, %c0_i32_0 : i32, i32, i32
  }
  func.func @transform_3(%arg0: i32, %arg1: i32) -> (i32, i32, i32) {
    %c0_i32 = arith.constant 0 : i32
    %c0_i32_0 = arith.constant 0 : i32
    %c0_i32_1 = arith.constant 0 : i32
    return %arg1, %c0_i32, %c0_i32_0 : i32, i32, i32
  }
  func.func @transform_4(%arg0: i32, %arg1: i32) -> (i32, i32, i32) {
    %c0_i32 = arith.constant 0 : i32
    %c0_i32_0 = arith.constant 0 : i32
    %c0_i32_1 = arith.constant 0 : i32
    return %arg1, %c0_i32, %c0_i32_0 : i32, i32, i32
  }
  func.func @transform_5(%arg0: i32, %arg1: i32) -> (i32, i32, i32) {
    %c0_i32 = arith.constant 0 : i32
    %c0_i32_0 = arith.constant 0 : i32
    %c0_i32_1 = arith.constant 0 : i32
    return %arg1, %c0_i32, %c0_i32_0 : i32, i32, i32
  }
  func.func @transform_6(%arg0: i32, %arg1: i32) -> (i32, i32, i32) {
    %c0_i32 = arith.constant 0 : i32
    %c0_i32_0 = arith.constant 0 : i32
    %c0_i32_1 = arith.constant 0 : i32
    return %arg1, %c0_i32, %c0_i32_0 : i32, i32, i32
  }
  func.func @transform_7(%arg0: i32, %arg1: i32) -> (i32, i32, i32) {
    %c0_i32 = arith.constant 0 : i32
    %c0_i32_0 = arith.constant 0 : i32
    %c0_i32_1 = arith.constant 0 : i32
    return %arg1, %c0_i32, %c0_i32_0 : i32, i32, i32
  }
  func.func @transform_8(%arg0: i32, %arg1: i32) -> (i32, i32, i32) {
    %c0_i32 = arith.constant 0 : i32
    %c0_i32_0 = arith.constant 0 : i32
    %c0_i32_1 = arith.constant 0 : i32
    return %arg1, %c0_i32, %c0_i32_0 : i32, i32, i32
  }
  func.func @transform_9(%arg0: i32, %arg1: i32) -> (i32, i32, i32) {
    %c0_i32 = arith.constant 0 : i32
    %c0_i32_0 = arith.constant 0 : i32
    %c0_i32_1 = arith.constant 0 : i32
    return %arg1, %c0_i32, %c0_i32_0 : i32, i32, i32
  }
  func.func @transform_10(%arg0: i32, %arg1: i32) -> (i32, i32, i32) {
    %c0_i32 = arith.constant 0 : i32
    %c0_i32_0 = arith.constant 0 : i32
    %c0_i32_1 = arith.constant 0 : i32
    return %arg1, %c0_i32, %c0_i32_0 : i32, i32, i32
  }
  func.func @transform_11(%arg0: i32, %arg1: i32) -> (i32, i32, i32) {
    %c0_i32 = arith.constant 0 : i32
    %c0_i32_0 = arith.constant 0 : i32
    %c0_i32_1 = arith.constant 0 : i32
    return %arg1, %c0_i32, %c0_i32_0 : i32, i32, i32
  }
  func.func @transform_12(%arg0: i32, %arg1: i32) -> (i32, i32, i32) {
    %c0_i32 = arith.constant 0 : i32
    %c0_i32_0 = arith.constant 0 : i32
    %c0_i32_1 = arith.constant 0 : i32
    return %arg1, %c0_i32, %c0_i32_0 : i32, i32, i32
  }
  func.func @transform_13(%arg0: i32, %arg1: i32) -> (i32, i32, i32) {
    %c0_i32 = arith.constant 0 : i32
    %c0_i32_0 = arith.constant 0 : i32
    %c0_i32_1 = arith.constant 0 : i32
    return %arg1, %c0_i32, %c0_i32_0 : i32, i32, i32
  }
  func.func @transform_14(%arg0: i32, %arg1: i32) -> (i32, i32, i32) {
    %c0_i32 = arith.constant 0 : i32
    %c0_i32_0 = arith.constant 0 : i32
    %c0_i32_1 = arith.constant 0 : i32
    return %arg1, %c0_i32, %c0_i32_0 : i32, i32, i32
  }
  func.func @transform_15(%arg0: i32, %arg1: i32) -> (i32, i32, i32) {
    %c0_i32 = arith.constant 0 : i32
    %c0_i32_0 = arith.constant 0 : i32
    %c0_i32_1 = arith.constant 0 : i32
    return %arg0, %c0_i32, %c0_i32_0 : i32, i32, i32
  }
}

</mosaic_0001>

<bundles_post_ra>
// kernel: tpu_custom_call.1
= control target key start
LH: loop header
LB: loop body
LE: loop exit
PB: predicated region body
PF: predicated region fallthrough
CT: control target
= control target key end

     0   :  { %s5280_s0 = inlined_call_operand.hbm [shape: f32[2,8,32], index: 0, kind: input, shape index: {}, may-alias: {0,15}]   ;;  %s5281_s1 = inlined_call_operand.vmem [shape: bf16[2,32,32], index: 1, kind: input, shape index: {}]   ;;  %s5282_s2 = inlined_call_operand.vmem [shape: f32[2,1,32], index: 2, kind: input, shape index: {}]   ;;  %s5283_s3 = inlined_call_operand.vmem [shape: bf16[2,32,32], index: 3, kind: input, shape index: {}]   ;;  %s5284_s4 = inlined_call_operand.hbm [shape: f32[2,1,32], index: 4, kind: input, shape index: {}]   ;;  %s5285_s5 = inlined_call_operand.vmem [shape: bf16[2,32,32], index: 5, kind: input, shape index: {}]   ;;  %s5286_s6 = inlined_call_operand.hbm [shape: f32[2,1,32], index: 6, kind: input, shape index: {}]   ;;  %s5287_s7 = inlined_call_operand.hbm [shape: bf16[2,32,32], index: 7, kind: input, shape index: {}]   ;;  %s5288_s8 = inlined_call_operand.hbm [shape: f32[2,1,32], index: 8, kind: input, shape index: {}]   ;;  %s5289_s9 = inlined_call_operand.hbm [shape: f32[2,1,32], index: 9, kind: input, shape index: {}]   ;;  %s5290_s10 = inlined_call_operand.vmem [shape: f32[2,1,32], index: 10, kind: input, shape index: {}]   ;;  %s5291_s11 = inlined_call_operand.vmem [shape: bf16[2,32,64], index: 11, kind: input, shape index: {}]   ;;  %s5292_s12 = inlined_call_operand.vmem [shape: f32[2,1,64], index: 12, kind: input, shape index: {}]   ;;  %s5293_s13 = inlined_call_operand.vmem [shape: bf16[2,64,32], index: 13, kind: input, shape index: {}]   ;;  %s5294_s14 = inlined_call_operand.vmem [shape: f32[2,1,32], index: 14, kind: input, shape index: {}]   ;;  %s5295_s15 = inlined_call_operand.hbm [shape: f32[2,8,32], index: 15, kind: output, shape index: {}, may-alias: {0,15}]  }
   0x1   :  { %5309 = sst [smem:[#allocation25_spill]] %s5280_s0 }
   0x2   :  { %5310 = sst [smem:[#allocation26_spill]] %s5281_s1 }
   0x3   :  { %5311 = sst [smem:[#allocation27_spill]] %s5283_s3 }
   0x4   :  { %5312 = sst [smem:[#allocation28_spill]] %s5284_s4 }
   0x5   :  { %5313 = sst [smem:[#allocation29_spill]] %s5285_s5 }
   0x6   :  { %5314 = sst [smem:[#allocation30_spill]] %s5286_s6 }
   0x7   :  { %5315 = sst [smem:[#allocation31_spill]] %s5287_s7 }
   0x8   :  { %5316 = sst [smem:[#allocation32_spill]] %s5288_s8 }
   0x9   :  { %5317 = sst [smem:[#allocation33_spill]] %s5289_s9 }
   0xa   :  { %5318 = sst [smem:[#allocation34_spill]] %s5290_s10 }
   0xb   :  { %5319 = sst [smem:[#allocation35_spill]] %s5291_s11 }
   0xc   :  { %5320 = sst [smem:[#allocation36_spill]] %s5292_s12 }
   0xd   :  { %5321 = sst [smem:[#allocation37_spill]] %s5293_s13 }
   0xe   :  { %5322 = sst [smem:[#allocation38_spill]] %s5294_s14 }
   0xf   :  { %5323 = sst [smem:[#allocation39_spill]] %s5295_s15 }
  0x10   :  { %20 = vsyncpa [#allocation3], 0 }
  0x11   :  { %21 = vsyncpa [#allocation6], 0 }
  0x12   :  { %23 = vsyncpa [#allocation6 + $0x1], 0 }
  0x13   :  { %24 = vsyncpa [#allocation9], 0 }
  0x14   :  { %26 = vsyncpa [#allocation9 + $0x1], 0 }
  0x15   :  { %27 = vsyncpa [#allocation12], 0 }
  0x16   :  { %29 = vsyncpa [#allocation12 + $0x1], 0 }
  0x17   :  { %30 = vsyncpa [#allocation4], 0  ;;  %s4461_s18 = smov 0   ;;  %s4463_s19 = smov 0  }
  0x18   :  { %s4465_s20 = smov 0   ;;  %s4467_s21 = smov 0  }
  0x19   :  { %s4469_s22 = smov 0   ;;  %s4471_s23 = smov 0  }
  0x1a LB: > { %5324 = sst [smem:[#allocation19_spill]] %s4341_s19  ;;  %s45_s24 = sadd.s32 1, %s4353_s22  ;;  %s4357_s23 = sphi %s4471_s23, %s36_s23   ;;  %s4353_s22 = sphi %s4469_s22, %s5374_s22   ;;  %s4349_s21 = sphi %s4467_s21, %s5373_s21   ;;  %s4345_s20 = sphi %s4465_s20, %s5372_s20   ;;  %s4341_s19 = sphi %s4463_s19, %s5371_s19   ;;  %s4337_s18 = sphi %s4461_s18, %s5370_s18  }
  0x1b   : > { %5325 = sst [smem:[#allocation20_spill]] %s4345_s20  ;;  %s159_s25 = sadd.s32 1, %s4345_s20 }
  0x1c   : > { %5326 = sst [smem:[#allocation21_spill]] %s4353_s22  ;;  %p46_p0 = scmp.ge.s32.totalorder %s45_s24, 2 }
  0x1d   : > { %5327 = sst [smem:[#allocation22_spill]] %s4357_s23  ;;  %p166_p1 = scmp.ne.s32.totalorder %s4345_s20, %s4341_s19 }
  0x1e   : > { %p167_p2 = scmp.eq.s32.totalorder %s4357_s23, 0  ;;  %s5376_s24 = smov (%p46_p0, %s45_s24), 0 }
  0x1f   : > { %5328 = sst [smem:[#allocation23_spill]] %s5376_s24  ;;  %p3951_p4 = scmp.lt.s32.totalorder %s4357_s23, 2 }
  0x20   : > { %p168_p3 = por %p167_p2, %p166_p1  ;;  %s156_s26 = ssub.s32 %s4353_s22, %s5376_s24 }
  0x21   : > { %p157_p5 = scmp.eq.s32.totalorder %s156_s26, 0  ;;  %s4503_s28 = sand.u32 1, %s4345_s20  }
  0x22   : > { %s4506_s29 = sshll.u32 %s4353_s22, 4  ;;  %s5330_s4 = sld [smem:[#allocation28_spill]] }
  0x23   : > { %s4509_s30 = scalar_select %p157_p5, %s4345_s20, %s159_s25  }
  0x24   : > { %s523_s27 = scalar_lea.vmem [#allocation5], %s4503_s28  ;;  %p4518_p6 = pnand %p3951_p4, %p168_p3 }
  0x25   : > { %5329 = sst [smem:[#allocation24_spill]] %s4509_s30  ;;  %s530_s26 = sshll.u32 %s523_s27, 4  ;;  %s4522_s26 = int_to_ptr.vmem [resolvable:$true] %s530_s26 }
  0x26   : > { %s5331_s24 = scalar_select %p4518_p6, 1, 0 }
  0x27   : > { %s5332_s30 = sand.u32 1, %s4357_s23   ;;  %p4533_p8 = pneg %p4518_p6 }
  0x28   : > { %s4515_s15 = scalar_lea.hbm %s5330_s4, %s4506_s29  ;;  %s4527_s20 = scalar_lea.sflag [#allocation6], %s5332_s30 }
  0x29   : > { %s4087_s16 = scalar_lea.hbm %s4515_s15, 16  ;;  %s4092_s14 = scalar_lea.hbm %s5330_s4, 32 }
  0x2a   : > { %p4088_p7 = scmp.ne.s32.totalorder %s4515_s15, %s4087_s16  ;;  %p4093_p11 = scmp.lt.u32.totalorder %s4515_s15, %s5330_s4 }
  0x2b   : > { %s5333_s17 = scalar_select %p4533_p8, 1, 0 }
  0x2c   : > { %p4090_p9 = pnand %p4533_p8, %p4088_p7  ;;  %p4094_p12 = scmp.lt.u32.totalorder %s4092_s14, %s4087_s16 }
  0x2d   : > { %p4096_p0 = scmp.lt.u32.totalorder %s4087_s16, %s4515_s15 }
  0x2e   : > { %p4091_p10 = pneg %p4090_p9  ;;  %p4095_p13 = por %p4094_p12, %p4093_p11 }
  0x30   : > { %p4097_p1 = por %p4096_p0, %p4095_p13 }
  0x32   : > { %p4098_p2 = pnand %p4097_p1, %p4091_p10 }
  0x34   : > { %4101 = shalt.err (!%p4098_p2)
}
  0x35   : > { %s4102_s30 = scalar_lea.vmem %s4522_s26, 16  ;;  %s4359_s13 = smov [#allocation5]  }
  0x36   : > { %p4103_p3 = scmp.ne.s32.totalorder %s4522_s26, %s4102_s30  ;;  %s4107_s27 = sshll.u32 %s4359_s13, 4  ;;  %s4108_s27 = int_to_ptr.vmem [resolvable:$false] %s4107_s27 }
  0x37   : > { %s4109_s12 = scalar_lea.vmem %s4108_s27, 32  ;;  %p4110_p7 = scmp.lt.s32.totalorder %s4522_s26, %s4108_s27 }
  0x38   : > { %p4105_p4 = pnand %p4103_p3, %p4533_p8  ;;  %p4111_p9 = scmp.lt.s32.totalorder %s4109_s12, %s4102_s30 }
  0x3a   : > { %p4106_p5 = pneg %p4105_p4  ;;  %p4112_p11 = por %p4111_p9, %p4110_p7 }
  0x3c   : > { %p4113_p12 = pnand %p4112_p11, %p4106_p5 }
  0x3e   : > { %4116 = shalt.err (!%p4113_p12)
}
  0x3f   : > { %3937 = dma.hbm_to_vmem [thread:$0]  (!%p4518_p6), %s4515_s15, 16, %s4522_s26, %s4527_s20  }
  0x40   : > { %s3706_s14 = sshll.u32 %s4353_s22, 8  ;;  %s5334_s7 = sld [smem:[#allocation31_spill]] }
  0x41   : > { %s5335_s30 = sshll.u32 %s4503_s28, 4  ;;  %s5336_s4 = sand.u32 1, %s4357_s23  }
  0x42   : > { %s566_s27 = scalar_lea.vmem [#allocation8], %s5335_s30  ;;  %s4569_s11 = scalar_lea.sflag [#allocation9], %s5336_s4 }
  0x43   : > { %s573_s12 = sshll.u32 %s566_s27, 4  ;;  %s4565_s12 = int_to_ptr.vmem [resolvable:$true] %s573_s12 }
  0x46   : > { %s4561_s13 = scalar_lea.hbm %s5334_s7, %s3706_s14  ;;  %s4122_s14 = scalar_lea.hbm %s5334_s7, 512 }
  0x47   : > { %s4117_s10 = scalar_lea.hbm %s4561_s13, 256  ;;  %p4123_p1 = scmp.lt.u32.totalorder %s4561_s13, %s5334_s7 }
  0x48   : > { %p4118_p10 = scmp.ne.s32.totalorder %s4561_s13, %s4117_s10  ;;  %p4124_p2 = scmp.lt.u32.totalorder %s4122_s14, %s4117_s10 }
  0x49   : > { %p4126_p4 = scmp.lt.u32.totalorder %s4117_s10, %s4561_s13 }
  0x4a   : > { %p4120_p13 = pnand %p4118_p10, %p4533_p8  ;;  %p4125_p3 = por %p4124_p2, %p4123_p1 }
  0x4c   : > { %p4121_p0 = pneg %p4120_p13  ;;  %p4127_p5 = por %p4126_p4, %p4125_p3 }
  0x4e   : > { %p4128_p7 = pnand %p4127_p5, %p4121_p0 }
  0x50   : > { %4131 = shalt.err (!%p4128_p7)
}
  0x51   : > { %s4132_s4 = scalar_lea.vmem %s4565_s12, 256  ;;  %s4360_s30 = smov [#allocation8]  }
  0x52   : > { %p4133_p9 = scmp.ne.s32.totalorder %s4565_s12, %s4132_s4  ;;  %s4137_s27 = sshll.u32 %s4360_s30, 4  ;;  %s4138_s27 = int_to_ptr.vmem [resolvable:$false] %s4137_s27 }
  0x53   : > { %s4139_s15 = scalar_lea.vmem %s4138_s27, 512  ;;  %p4140_p10 = scmp.lt.s32.totalorder %s4565_s12, %s4138_s27 }
  0x54   : > { %p4135_p11 = pnand %p4133_p9, %p4533_p8  ;;  %p4141_p13 = scmp.lt.s32.totalorder %s4139_s15, %s4132_s4 }
  0x56   : > { %p4136_p12 = pneg %p4135_p11  ;;  %p4142_p1 = por %p4141_p13, %p4140_p10 }
  0x58   : > { %p4143_p2 = pnand %p4142_p1, %p4136_p12 }
  0x5a   : > { %4146 = shalt.err (!%p4143_p2)
}
  0x5b   : > { %s4361_s10 = smov 64   ;;  %s4362_s26 = smov 4  }
  0x5c   : > { %3943 = dma.hbm_to_vmem [thread:$0]  (!%p4518_p6), %s4561_s13, 256, %s4565_s12, %s4569_s11, %s4361_s10, %s4361_s10, %s4362_s26  }
  0x5d   : > { %s4594_s14 = sadd.s32 4294967295, %s4357_s23   ;;  %p172_p0 = scmp.ne.s32.totalorder %s4341_s19, %s4337_s18 }
  0x5e   : > { %p5301_p3 = scmp.eq.s32.totalorder %s4594_s14, 0  ;;  %p3618_p4 = scmp.ge.s32.totalorder %s4357_s23, 1 }
  0x5f   : > { %p469_p5 = scmp.lt.s32.totalorder %s4357_s23, 3  ;;  %s4363_s13 = smov [#allocation2]  }
  0x60   : > { %p4603_p7 = por %p5301_p3, %p172_p0  ;;  %s484_s12 = sshll.u32 %s4363_s13, 4  ;;  %s485_s12 = int_to_ptr.vmem [resolvable:$true] %s484_s12 }
  0x61   : > { %p4607_p9 = pnand %p3618_p4, %p469_p5  ;;  %s5340_s6 = sld [smem:[#allocation30_spill]] }
  0x62   : > { %s5337_s25 = scalar_select %p4603_p7, 1, 0 }
  0x63   : > { %s5338_s16 = scalar_select %p4607_p9, 1, 0 }
  0x64   : > { %p3930_p11 = pneg %p4607_p9  ;;  %s548_s15 = scalar_lea.vmem [#allocation7], %s4503_s28 }
  0x65   : > { %s555_s10 = sshll.u32 %s548_s15, 4  ;;  %s5341_s0 = sld [smem:[#allocation25_spill]]  ;;  %s4626_s10 = int_to_ptr.vmem [resolvable:$true] %s555_s10 }
  0x66   : > { %p4615_p12 = pnand %p3930_p11, %p5301_p3 }
  0x67   : > { %s4623_s27 = scalar_lea.hbm %s5340_s6, %s4506_s29 }
  0x68   : > { %p4149_p13 = pneg %p4615_p12 }
  0x6b   : > { %s4147_s7 = scalar_lea.hbm %s5341_s0, 256 }
  0x6c   : > { %p4148_p10 = scmp.ne.s32.totalorder %s5341_s0, %s4147_s7  ;;  %p4154_p0 = scmp.lt.u32.totalorder %s4147_s7, %s5341_s0 }
  0x6e   : > { %p4150_p1 = pnand %p4149_p13, %p4148_p10 }
  0x70   : > { %p4151_p2 = pneg %p4150_p1 }
  0x72   : > { %p4156_p4 = pnand %p4154_p0, %p4151_p2 }
  0x74   : > { %4159 = shalt.err (!%p4156_p4)
}
  0x75   : > { %s4160_s15 = scalar_lea.vmem %s485_s12, 256  ;;  %p4168_p7 = scmp.lt.s32.totalorder %s485_s12, %s485_s12 }
  0x76   : > { %p4161_p5 = scmp.ne.s32.totalorder %s485_s12, %s4160_s15  ;;  %p4169_p9 = scmp.lt.s32.totalorder %s4160_s15, %s4160_s15 }
  0x78   : > { %p4163_p11 = pnand %p4161_p5, %p4149_p13  ;;  %p4170_p6 = por %p4169_p9, %p4168_p7 }
  0x7a   : > { %p4164_p3 = pneg %p4163_p11 }
  0x7c   : > { %p4171_p8 = pnand %p4170_p6, %p4164_p3 }
  0x7e   : > { %4174 = shalt.err (!%p4171_p8)
}
  0x7f   : > { %s4364_s22 = smov 128   ;;  %s4365_s23 = smov 8  }
  0x80   : > { %3933 = dma.hbm_to_vmem [thread:$0]  (!%p4615_p12), %s5341_s0, 256, %s485_s12, [#allocation3], %s4364_s22, %s4364_s22, %s4365_s23  }
  0x81   : > { %s4175_s13 = scalar_lea.hbm %s4623_s27, 16  ;;  %p5342_p13 = scmp.ne.s32.totalorder %s5333_s17, 0 }
  0x82   : > { %p4176_p10 = scmp.ne.s32.totalorder %s4623_s27, %s4175_s13  ;;  %s4180_s15 = scalar_lea.hbm %s5340_s6, 32 }
  0x83   : > { %p4181_p6 = scmp.lt.u32.totalorder %s4623_s27, %s5340_s6  ;;  %p4182_p8 = scmp.lt.u32.totalorder %s4180_s15, %s4175_s13 }
  0x84   : > { %p4178_p1 = pnand %p4176_p10, %p5342_p13  ;;  %p4184_p9 = scmp.lt.u32.totalorder %s4175_s13, %s4623_s27 }
  0x85   : > { %p4183_p3 = por %p4182_p8, %p4181_p6 }
  0x86   : > { %p4179_p7 = pneg %p4178_p1 }
  0x87   : > { %p4185_p2 = por %p4184_p9, %p4183_p3 }
  0x89   : > { %p4186_p0 = pnand %p4185_p2, %p4179_p7 }
  0x8b   : > { %4189 = shalt.err (!%p4186_p0)
}
  0x8c   : > { %s4190_s12 = scalar_lea.vmem %s4626_s10, 16  ;;  %s4366_s18 = smov [#allocation7]  }
  0x8d   : > { %p4191_p12 = scmp.ne.s32.totalorder %s4626_s10, %s4190_s12  ;;  %s4195_s22 = sshll.u32 %s4366_s18, 4  ;;  %s4196_s22 = int_to_ptr.vmem [resolvable:$false] %s4195_s22 }
  0x8e   : > { %s4197_s3 = scalar_lea.vmem %s4196_s22, 32  ;;  %p4198_p11 = scmp.lt.s32.totalorder %s4626_s10, %s4196_s22 }
  0x8f   : > { %p4193_p4 = pnand %p4191_p12, %p5342_p13  ;;  %p4199_p10 = scmp.lt.s32.totalorder %s4197_s3, %s4190_s12 }
  0x91   : > { %p4194_p5 = pneg %p4193_p4  ;;  %p4200_p1 = por %p4199_p10, %p4198_p11 }
  0x93   : > { %p4201_p6 = pnand %p4200_p1, %p4194_p5 }
  0x95   : > { %4204 = shalt.err (!%p4201_p6)
}
  0x96   : > { %p5343_p7 = scmp.ne.s32.totalorder %s5331_s24, 0  ;;  %s5344_s8 = sld [smem:[#allocation32_spill]] }
  0x97   : > { %s586_s26 = scalar_lea.vmem [#allocation10], %s4503_s28 }
  0x98   : > { %3940 = dma.hbm_to_vmem [thread:$0]  (!%p5343_p7), %s4623_s27, 16, %s4626_s10, %s4527_s20  }
  0x99   : > { %s593_s13 = sshll.u32 %s586_s26, 4  ;;  %s594_s13 = int_to_ptr.vmem [resolvable:$true] %s593_s13 }
  0x9c   : > { %s4670_s7 = scalar_lea.hbm %s5344_s8, %s4506_s29  ;;  %s4210_s20 = scalar_lea.hbm %s5344_s8, 32 }
  0x9d   : > { %s4205_s4 = scalar_lea.hbm %s4670_s7, 16  ;;  %p4211_p2 = scmp.lt.u32.totalorder %s4670_s7, %s5344_s8 }
  0x9e   : > { %p4206_p8 = scmp.ne.s32.totalorder %s4670_s7, %s4205_s4  ;;  %p4212_p0 = scmp.lt.u32.totalorder %s4210_s20, %s4205_s4 }
  0x9f   : > { %p4214_p4 = scmp.lt.u32.totalorder %s4205_s4, %s4670_s7 }
  0xa0   : > { %p4208_p3 = pnand %p4206_p8, %p5342_p13  ;;  %p4213_p12 = por %p4212_p0, %p4211_p2 }
  0xa2   : > { %p4209_p9 = pneg %p4208_p3  ;;  %p4215_p5 = por %p4214_p4, %p4213_p12 }
  0xa4   : > { %p4216_p11 = pnand %p4215_p5, %p4209_p9 }
  0xa6   : > { %4219 = shalt.err (!%p4216_p11)
}
  0xa7   : > { %s4220_s12 = scalar_lea.vmem %s594_s13, 16  ;;  %s4367_s18 = smov [#allocation10]  }
  0xa8   : > { %p4221_p10 = scmp.ne.s32.totalorder %s594_s13, %s4220_s12  ;;  %s4225_s22 = sshll.u32 %s4367_s18, 4  ;;  %s4226_s22 = int_to_ptr.vmem [resolvable:$false] %s4225_s22 }
  0xa9   : > { %s4227_s3 = scalar_lea.vmem %s4226_s22, 32  ;;  %p4228_p8 = scmp.lt.s32.totalorder %s594_s13, %s4226_s22 }
  0xaa   : > { %p4223_p1 = pnand %p4221_p10, %p5342_p13  ;;  %p4229_p3 = scmp.lt.s32.totalorder %s4227_s3, %s4220_s12 }
  0xac   : > { %p4224_p6 = pneg %p4223_p1  ;;  %p4230_p7 = por %p4229_p3, %p4228_p8 }
  0xae   : > { %p4231_p0 = pnand %p4230_p7, %p4224_p6 }
  0xb0   : > { %4234 = shalt.err (!%p4231_p0)
}
  0xb1   : > { %p5345_p2 = scmp.ne.s32.totalorder %s5331_s24, 0  ;;  %s5346_s9 = sld [smem:[#allocation33_spill]] }
  0xb2   : > { %s603_s4 = scalar_lea.vmem [#allocation11], %s4503_s28  ;;  %s601_s15 = scalar_lea.sflag [#allocation12], %s4503_s28 }
  0xb3   : > { %3946 = dma.hbm_to_vmem [thread:$0]  (!%p5345_p2), %s4670_s7, 16, %s594_s13, %s4569_s11  }
  0xb4   : > { %s610_s30 = sshll.u32 %s603_s4, 4  ;;  %s611_s30 = int_to_ptr.vmem [resolvable:$true] %s610_s30 }
  0xb7   : > { %s4695_s26 = scalar_lea.hbm %s5346_s9, %s4506_s29  ;;  %s4240_s7 = scalar_lea.hbm %s5346_s9, 32 }
  0xb8   : > { %s4235_s20 = scalar_lea.hbm %s4695_s26, 16  ;;  %p4241_p4 = scmp.lt.u32.totalorder %s4695_s26, %s5346_s9 }
  0xb9   : > { %p4236_p7 = scmp.ne.s32.totalorder %s4695_s26, %s4235_s20  ;;  %p4242_p5 = scmp.lt.u32.totalorder %s4240_s7, %s4235_s20 }
  0xba   : > { %p4244_p10 = scmp.lt.u32.totalorder %s4235_s20, %s4695_s26 }
  0xbb   : > { %p4238_p9 = pnand %p4236_p7, %p5342_p13  ;;  %p4243_p11 = por %p4242_p5, %p4241_p4 }
  0xbd   : > { %p4239_p12 = pneg %p4238_p9  ;;  %p4245_p1 = por %p4244_p10, %p4243_p11 }
  0xbf   : > { %p4246_p6 = pnand %p4245_p1, %p4239_p12 }
  0xc1   : > { %4249 = shalt.err (!%p4246_p6)
}
  0xc2   : > { %s4250_s28 = scalar_lea.vmem %s611_s30, 16  ;;  %s4368_s10 = smov [#allocation11]  }
  0xc3   : > { %p4251_p8 = scmp.ne.s32.totalorder %s611_s30, %s4250_s28  ;;  %s4255_s12 = sshll.u32 %s4368_s10, 4  ;;  %s4256_s12 = int_to_ptr.vmem [resolvable:$false] %s4255_s12 }
  0xc4   : > { %s4257_s18 = scalar_lea.vmem %s4256_s12, 32  ;;  %p4258_p7 = scmp.lt.s32.totalorder %s611_s30, %s4256_s12 }
  0xc5   : > { %p4253_p3 = pnand %p4251_p8, %p5342_p13  ;;  %p4259_p9 = scmp.lt.s32.totalorder %s4257_s18, %s4250_s28 }
  0xc7   : > { %p4254_p0 = pneg %p4253_p3  ;;  %p4260_p2 = por %p4259_p9, %p4258_p7 }
  0xc9   : > { %p4261_p4 = pnand %p4260_p2, %p4254_p0 }
  0xcb   : > { %4264 = shalt.err (!%p4261_p4)
}
  0xcc   : > { %p5347_p5 = scmp.ne.s32.totalorder %s5331_s24, 0  ;;  %p5348_p12 = scmp.ne.s32.totalorder %s5338_s16, 0 }
  0xcd   : > { %p5349_p11 = scmp.eq.s32.totalorder (!%p5348_p12), %s4594_s14, 0 }
  0xce   : > { %3949 = dma.hbm_to_vmem [thread:$0]  (!%p5347_p5), %s4695_s26, 16, %s611_s30, %s601_s15  }
  0xcf   : > { %653 = sbr.rel (%p5348_p12) target bundleno = 2615 (0xa37), region = 80 }
  0xd6   : > { %4316 = dma.done.wait (%p5349_p11), [#allocation3], 256   ;;  %p5350_p13 = pmov %p5349_p11 }
  0xd7   : > { %s659_s17 = sand.u32 1, %s4594_s14   ;;  %s4724_s22 = sand.u32 1, %s4341_s19  }
  0xd8   : > { %4318 = vsyncadd (%p5350_p13), [#allocation3], 4294967040  ;;  %s660_s3 = scalar_lea.sflag [#allocation6], %s659_s17  ;;  %p5351_p2 = scmp.ne.s32.totalorder %s5337_s25, 0 }
  0xda   : > { %4320 = dma.done.wait (%p5351_p2), %s660_s3, 32  }
  0xdb   : > { %4322 = vsyncadd (%p5351_p2), %s660_s3, 4294967264  ;;  %s3630_s16 = sshll.u32 %s4724_s22, 4  ;;  %s676_s23 = scalar_lea.sflag [#allocation9], %s659_s17 }
  0xdc   : > { %s4733_s26 = scalar_lea.vmem [#allocation8], %s3630_s16 }
  0xdd   : > { %4324 = dma.done.wait (%p5351_p2), %s676_s23, 272  }
  0xde   : > { %4326 = vsyncadd (%p5351_p2), %s676_s23, 4294967024  ;;  %s693_s30 = scalar_lea.sflag [#allocation12], %s4724_s22 }
  0xdf   : > { %4328 = dma.done.wait (%p5351_p2), %s693_s30, 16  }
  0xe0   : > { %4330 = vsyncadd (%p5351_p2), %s693_s30, 4294967280  ;;  %p791_p10 = scmp.lt.s32.totalorder %s4349_s21, 1  ;;  %s5352_s1 = sld [smem:[#allocation26_spill]] }
  0xe1   : > { %s5353_s18 = sld [smem:[#allocation27_spill]]  ;;  %s5354_s23 = sld [smem:[#allocation29_spill]] }
  0xe2   : > { %s4748_s20 = scalar_select %p791_p10, %s4349_s21, 1 }
  0xe3   : > { %s5355_s5 = sld [smem:[#allocation34_spill]]  ;;  %s5356_s13 = sld [smem:[#allocation35_spill]] }
  0xe4   : > { %s3707_s27 = sshll.u32 %s4748_s20, 4  ;;  %s3711_s10 = sshll.u32 %s4748_s20, 5 }
  0xe5   : > { %s5358_s8 = sld [smem:[#allocation38_spill]]  ;;  %s5359_s9 = sld [smem:[#allocation37_spill]] }
  0xe6   : > { %s4758_s25 = scalar_lea.vmem %s5352_s1, %s3707_s27  ;;  %s5357_s1 = sld [smem:[#allocation36_spill]] }
  0xe7   : > { %s803_s17 = scalar_lea.vmem %s5353_s18, %s3707_s27  ;;  %s4766_s30 = scalar_lea.vmem %s5354_s23, %s3707_s27 }
  0xe8   : > { %p3641_p1 = scmp.ne.s32.totalorder %s4349_s21, 0 }
  0xe9   : > { %s811_s24 = scalar_lea.vmem %s5355_s5, %s4748_s20  ;;  %s4775_s0 = scalar_lea.vmem %s5356_s13, %s3707_s27  ;;  %v834_v0 = vld [vmem:[#allocation2] sm:$0xff] (!%p3641_p1)  ;;  %vm836_vm0 = vcmask (!%p3641_p1), 261120   ;;  %v835_v1 = vld [vmem:[#allocation2 + $0x8] sm:$0xff] (!%p3641_p1) }
  0xea   : > { %833 = sbr.rel (%p3641_p1) target bundleno = 241 (0xf1), region = 108  ;;  %837 = vst.msk [vmem:[#allocation13] sm:$0xff] (!%p3641_p1), %vm836_vm0, %v834_v0  ;;  %838 = vst.msk [vmem:[#allocation13 + $0x8] sm:$0xff] (!%p3641_p1), %vm836_vm0, %v835_v1 }
  0xeb   : > { %s827_s3 = scalar_lea.vmem %s5358_s8, %s4748_s20  ;;  %s4789_s19 = scalar_lea.vmem %s5359_s9, %s3711_s10 }
  0xec   : > { %s819_s6 = scalar_lea.vmem %s5357_s1, %s4748_s20 }
  0xf1 PF: > { %v4035_v2 = vld [vmem:[%s803_s17] sm:$0xff]   ;;  %v4369_v3 = vmov 0.0   ;;  %v4037_v5 = vld [vmem:[%s803_s17 + $0x8] sm:$0xff]   ;;  %vm4370_vm1 = vmmov 0   ;;  %v839_v6 = vld [vmem:[#allocation13] sm:$0xff]  ;;  %vm865_vm2 = vcmask 261120   ;;  %s5361_s21 = scalar_lea.vmem %s5282_s2, %s4748_s20  ;;  %v1063_v28 = vlaneseq }
  0xf2   : > { %3772 = vmatprep.subr.bf16.mxu1 %v4369_v3  ;;  %3764 = vmatprep.subr.bf16.mxu0 %v4369_v3  ;;  %v4036_v4 = vld [vmem:[%s4758_s25] sm:$0xff]   ;;  %v4038_v8 = vld [vmem:[%s4758_s25 + $0x8] sm:$0xff]   ;;  %s5360_s1 = scalar_lea.vmem [#allocation5], %s4724_s22  ;;  %s4371_s5 = smov 104   ;;  %v4374_v26 = vmov 1983009808  }
  0xf3   : > { %3773 = vmatpush3.bf16.msra.mxu1 %v4035_v2  ;;  %3776 = vmatprep.mubr.msk.bf16.mxu1 %vm4370_vm1, %v4369_v3  ;;  %v840_v7 = vld [vmem:[#allocation13 + $0x8] sm:$0xff]  ;;  %v4040_v11 = vld [vmem:[%s4766_s30 + $0x8] sm:$0xff]   ;;  %s4372_s4 = smov 120   ;;  %s4373_s15 = smov 112   ;;  %v1061_v27 = vunpack.c.l.s4 %v4374_v26  ;;  %v4375_v30 = vmov 1934713408  }
  0xf4   : > { %3774 = vmatprep.subr.bf16.mxu1 %v4369_v3  ;;  %3765 = vmatpush3.bf16.msra.mxu0 %v4036_v4  ;;  %v841_v9 = vpack.c.bf16 %v840_v7, %v839_v6  ;;  %v4039_v10 = vld [vmem:[%s4766_s30] sm:$0xff]   ;;  %s5362_s27 = scalar_lea.vmem [#allocation7], %s4724_s22  ;;  %v1093_v31 = vunpack.c.l.s4 %v4375_v30  ;;  %v1064_v34 = vshrl.u32 %v1063_v28, 7  ;;  %vm1938_vm3 = vcmask 64512   ;;  %s4376_s13 = smov 16  }
  0xf5   : > { %3766 = vmatprep.subr.bf16.mxu0 %v4369_v3  ;;  %3768 = vmatprep.mubr.msk.bf16.mxu0 %vm4370_vm1, %v4369_v3  ;;  %v3646_v12 = vld [vmem:[%s5360_s1] ss:$0 sm:$0xff]  ;;  %v1062_v33 = vunpack.c.0.s8 %v1061_v27  ;;  %vm2414_vm4 = vcmask 1043456   ;;  %s4377_s25 = smov 8   ;;  %s4378_s17 = smov 24   ;;  %vm3078_vm5 = vcmask 130048  }
  0xf6   : > { %v3642_v14 = vld [vmem:[%s5361_s21] ss:$0 sm:$0xff]  ;;  %v1094_v40 = vunpack.c.0.s8 %v1093_v31  ;;  %vm3081_vm6 = vcmask 195584   ;;  %vm3311_vm7 = vcmask 523264   ;;  %p3953_p6 = scmp.eq.s32.totalorder %s4594_s14, 1 }
  0xf7   : > { %3775 = vmatpush3.bf16.msra.mxu1 %v4037_v5  ;;  %v3650_v29 = vld [vmem:[%s5362_s27] ss:$0 sm:$0xff]  ;;  %v4854_v43 = vsub.s32 %v1062_v33, %v1064_v34 }
  0xf8   : > { %3767 = vmatpush3.bf16.msra.mxu0 %v4038_v8  ;;  %3788 = vmatprep.subr.bf16.mxu1 %v4369_v3  ;;  %v4856_v50 = vsub.s32 %v1094_v40, %v1064_v34 }
  0xf9   : > { %3780 = vmatprep.subr.bf16.mxu0 %v4369_v3 }
  0xfa   : > { %3777 = vmatmul.mubr.msk.bf16.vlgmr.msra.gmra.mrb[0].mxu1 %vm865_vm2, %v841_v9 }
  0xfb   : > { %3769 = vmatmul.mubr.msk.bf16.vlgmr.msra.gmra.mrb[0].mxu0 %vm865_vm2, %v841_v9  ;;  %3790 = vmatprep.mubr.msk.bf16.mxu1 %vm4370_vm1, %v4369_v3 }
  0xfc   : > { %3784 = vmatprep.mubr.msk.bf16.mxu0 %vm4370_vm1, %v4369_v3  ;;  %3781 = vmatpush3.bf16.msra.mxu0 %v4039_v10 }
  0xfd   : > { %3782 = vmatprep.subr.bf16.mxu0 %v4369_v3 }
 0x100   : > { %3783 = vmatpush3.bf16.msra.mxu0 %v4040_v11 }
 0x101   : > { %3794 = vmatprep.subr.bf16.mxu0 %v4369_v3 }
 0x103   : > { %3785 = vmatmul.mubr.msk.bf16.vlgmr.msra.gmra.mrb[4].mxu0 %vm865_vm2, %v841_v9 }
 0x104   : > { %3796 = vmatprep.mubr.msk.bf16.mxu0 %vm4370_vm1, %v4369_v3 }
 0x1cd   : > { %v967_v13 = vpop.f32.mrb[0].mxu1 }
 0x1ce   : > { %v968_v15 = vadd.f32 %v3646_v12, %v967_v13  ;;  %v3778_v16 = vpop.f32.mrb[1].mxu1  ;;  %v903_v17 = vpop.f32.mrb[0].mxu0 }
 0x1cf   : > { %v970_v18 = vpop.f32.mrb[2].mxu1  ;;  %v3770_v19 = vpop.f32.mrb[1].mxu0  ;;  %v904_v21 = vadd.f32 %v3642_v14, %v903_v17 }
 0x1d0   : > { %1352 = vrot.lane.b32.xlu1 %v968_v15, %s4371_s5  ;;  %1340 = vrot.lane.b32.xlu0 %v968_v15, %s4372_s4  ;;  %v3779_v20 = vpop.f32.mrb[3].mxu1  ;;  %v906_v22 = vpop.f32.mrb[2].mxu0  ;;  %v4830_v24 = vadd.f32 %v3646_v12, %v970_v18 }
 0x1d1   : > { %v3771_v23 = vpop.f32.mrb[3].mxu0  ;;  %v4836_v25 = vadd.f32 %v3642_v14, %v906_v22 }
 0x1d4   : > { %1346 = vrot.lane.b32.xlu0 %v968_v15, %s4373_s15  ;;  %1040 = vrot.lane.b32.xlu1 %v904_v21, %s4372_s4 }
 0x1d6   : > { %v1031_v32 = vpop.f32.mrb[4].mxu0 }
 0x1d7   : > { %v4848_v35 = vadd.f32 %v3650_v29, %v1031_v32  ;;  %v3786_v36 = vpop.f32.mrb[5].mxu0 }
 0x1d8   : > { %1046 = vrot.lane.b32.xlu0 %v904_v21, %s4373_s15  ;;  %1052 = vrot.lane.b32.xlu1 %v904_v21, %s4371_s5  ;;  %v1034_v39 = vpop.f32.mrb[6].mxu0 }
 0x1d9   : > { %v4852_v41 = vadd.f32 %v3650_v29, %v1034_v39  ;;  %v3787_v42 = vpop.f32.mrb[7].mxu0 }
 0x1dc   : > { %1342 = vrot.lane.b32.xlu0 %v4830_v24, %s4372_s4  ;;  %1348 = vrot.lane.b32.xlu1 %v4830_v24, %s4373_s15 }
 0x1e0   : > { %1354 = vrot.lane.b32.xlu0 %v4830_v24, %s4371_s5  ;;  %1042 = vrot.lane.b32.xlu1 %v4836_v25, %s4372_s4 }
 0x1e4   : > { %1048 = vrot.lane.b32.xlu0 %v4836_v25, %s4373_s15  ;;  %1054 = vrot.lane.b32.xlu1 %v4836_v25, %s4371_s5 }
 0x1e8   : > { %1640 = vrot.lane.b32.xlu1 %v4848_v35, %s4372_s4 }
 0x242   : > { %v1353_v37 = vpop.permute.xlu1 %1352  ;;  %v1341_v38 = vpop.permute.xlu0 %1340 }
 0x243   : > { %v1374_v44 = vcombine.low %v1341_v38, %v1353_v37  ;;  %v1375_v45 = vcombine.high %v1341_v38, %v1353_v37 }
 0x245   : > { %v1382_v51 = vrot.slane %v1374_v44, %v4854_v43  ;;  %v1389_v52 = vrot.slane %v1375_v45, %v4854_v43 }
 0x246   : > { %v1347_v46 = vpop.permute.xlu0 %1346  ;;  %v1041_v47 = vpop.permute.xlu1 %1040 }
 0x247   : > { %v1358_v48 = vcombine.low %v968_v15, %v1347_v46  ;;  %v1359_v49 = vcombine.high %v968_v15, %v1347_v46 }
 0x249   : > { %v1366_v53 = vrot.slane %v1358_v48, %v4854_v43  ;;  %v1373_v54 = vrot.slane %v1359_v49, %v4854_v43 }
 0x24a   : > { %v1047_v55 = vpop.permute.xlu0 %1046  ;;  %v1053_v56 = vpop.permute.xlu1 %1052 }
 0x24b   : > { %v1390_v57 = vcombine.low %v1366_v53, %v1382_v51  ;;  %v1391_v58 = vcombine.high %v1366_v53, %v1382_v51  ;;  %v1406_v59 = vcombine.low %v1373_v54, %v1389_v52  ;;  %v1407_v60 = vcombine.high %v1373_v54, %v1389_v52 }
 0x24c   : > { %v1058_v61 = vcombine.low %v904_v21, %v1047_v55  ;;  %v1059_v62 = vcombine.high %v904_v21, %v1047_v55  ;;  %v1074_v63 = vcombine.low %v1041_v47, %v1053_v56  ;;  %v1075_v0 = vcombine.high %v1041_v47, %v1053_v56 }
 0x24d   : > { %v1398_v1 = vrot.slane %v1390_v57, %v4856_v50  ;;  %v1405_v2 = vrot.slane %v1391_v58, %v4856_v50  ;;  %v1414_v4 = vrot.slane %v1406_v59, %v4856_v50  ;;  %v1421_v5 = vrot.slane %v1407_v60, %v4856_v50 }
 0x24e   : > { %v1066_v6 = vrot.slane %v1058_v61, %v4854_v43  ;;  %v1073_v7 = vrot.slane %v1059_v62, %v4854_v43  ;;  %v1082_v8 = vrot.slane %v1074_v63, %v4854_v43  ;;  %v1089_v9 = vrot.slane %v1075_v0, %v4854_v43  ;;  %v1343_v10 = vpop.permute.xlu0 %1342  ;;  %v1349_v11 = vpop.permute.xlu1 %1348 }
 0x24f   : > { %v1494_v16 = vcombine.low %v1398_v1, %v1405_v2  ;;  %v3658_v17 = vcombine.high %v1398_v1, %v1405_v2  ;;  %v1510_v18 = vcombine.low %v1414_v4, %v1421_v5  ;;  %v3659_v19 = vcombine.high %v1414_v4, %v1421_v5 }
 0x250   : > { %v1090_v12 = vcombine.low %v1066_v6, %v1082_v8  ;;  %v1091_v13 = vcombine.high %v1066_v6, %v1082_v8  ;;  %v1106_v14 = vcombine.low %v1073_v7, %v1089_v9  ;;  %v1107_v15 = vcombine.high %v1073_v7, %v1089_v9 }
 0x251   : > { %v1426_v28 = vcombine.low %v4830_v24, %v1349_v11  ;;  %v1427_v29 = vcombine.high %v4830_v24, %v1349_v11  ;;  %v1501_v48 = vrot.slane %v1494_v16, %v4854_v43  ;;  %v1509_v49 = vrot.slane %v3658_v17, %v4854_v43 }
 0x252   : > { %v1098_v20 = vrot.slane %v1090_v12, %v4856_v50  ;;  %v1105_v21 = vrot.slane %v1091_v13, %v4856_v50  ;;  %v1114_v22 = vrot.slane %v1106_v14, %v4856_v50  ;;  %v1121_v23 = vrot.slane %v1107_v15, %v4856_v50  ;;  %v1355_v26 = vpop.permute.xlu0 %1354  ;;  %v1043_v27 = vpop.permute.xlu1 %1042 }
 0x253   : > { %v1442_v30 = vcombine.low %v1343_v10, %v1355_v26  ;;  %v1443_v31 = vcombine.high %v1343_v10, %v1355_v26  ;;  %v1434_v37 = vrot.slane %v1426_v28, %v4854_v43  ;;  %v1441_v38 = vrot.slane %v1427_v29, %v4854_v43 }
 0x254   : > { %v1194_v32 = vcombine.low %v1098_v20, %v1105_v21  ;;  %v3654_v33 = vcombine.high %v1098_v20, %v1105_v21  ;;  %v1210_v34 = vcombine.low %v1114_v22, %v1121_v23  ;;  %v3655_v36 = vcombine.high %v1114_v22, %v1121_v23 }
 0x255   : > { %v1450_v39 = vrot.slane %v1442_v30, %v4854_v43  ;;  %v1457_v40 = vrot.slane %v1443_v31, %v4854_v43  ;;  %v1517_v51 = vrot.slane %v1510_v18, %v4854_v43  ;;  %v1525_v52 = vrot.slane %v3659_v19, %v4854_v43 }
 0x256   : > { %v1049_v47 = vpop.permute.xlu0 %1048  ;;  %v1055_v24 = vpop.permute.xlu1 %1054  ;;  %v4885_v53 = vrot.slane %v1194_v32, %v4854_v43  ;;  %v4888_v54 = vrot.slane %v3654_v33, %v4854_v43  ;;  %v4891_v55 = vrot.slane %v1210_v34, %v4854_v43  ;;  %v4894_v56 = vrot.slane %v3655_v36, %v4854_v43 }
 0x257   : > { %v1458_v42 = vcombine.low %v1434_v37, %v1450_v39  ;;  %v1459_v44 = vcombine.high %v1434_v37, %v1450_v39  ;;  %v1474_v45 = vcombine.low %v1441_v38, %v1457_v40  ;;  %v1475_v46 = vcombine.high %v1441_v38, %v1457_v40 }
 0x258   : > { %v1126_v57 = vcombine.low %v4836_v25, %v1049_v47  ;;  %v1127_v58 = vcombine.high %v4836_v25, %v1049_v47  ;;  %v1142_v59 = vcombine.low %v1043_v27, %v1055_v24  ;;  %v1143_v60 = vcombine.high %v1043_v27, %v1055_v24 }
 0x259   : > { %v1466_v61 = vrot.slane %v1458_v42, %v4856_v50  ;;  %v1473_v62 = vrot.slane %v1459_v44, %v4856_v50  ;;  %v1482_v63 = vrot.slane %v1474_v45, %v4856_v50  ;;  %v1489_v0 = vrot.slane %v1475_v46, %v4856_v50 }
 0x25a   : > { %v1134_v1 = vrot.slane %v1126_v57, %v4854_v43  ;;  %v1141_v2 = vrot.slane %v1127_v58, %v4854_v43  ;;  %v1150_v4 = vrot.slane %v1142_v59, %v4854_v43  ;;  %v1157_v5 = vrot.slane %v1143_v60, %v4854_v43 }
 0x25b   : > { %v1226_v25 = vcombine.low %v4885_v53, %v4888_v54  ;;  %v1242_v6 = vcombine.low %v4891_v55, %v4894_v56  ;;  %v1562_v9 = vcombine.low %v1466_v61, %v1473_v62  ;;  %v3660_v10 = vcombine.high %v1466_v61, %v1473_v62 }
 0x25c   : > { %v1158_v7 = vcombine.low %v1134_v1, %v1150_v4  ;;  %v1159_v8 = vcombine.high %v1134_v1, %v1150_v4  ;;  %v1526_v11 = vcombine.low %v1501_v48, %v1509_v49  ;;  %v1542_v12 = vcombine.low %v1517_v51, %v1525_v52 }
 0x25d   : > { %v1578_v13 = vcombine.low %v1482_v63, %v1489_v0  ;;  %v3661_v14 = vcombine.high %v1482_v63, %v1489_v0  ;;  %v1174_v15 = vcombine.low %v1141_v2, %v1157_v5  ;;  %v1175_v16 = vcombine.high %v1141_v2, %v1157_v5 }
 0x25e   : > { %v1227_v17 = vcombine.high %v4885_v53, %v4888_v54  ;;  %v1243_v18 = vcombine.high %v4891_v55, %v4894_v56  ;;  %v1534_v19 = vrot.slane %v1526_v11, %v4856_v50  ;;  %v1550_v20 = vrot.slane %v1542_v12, %v4856_v50 }
 0x25f   : > { %v1166_v21 = vrot.slane %v1158_v7, %v4856_v50  ;;  %v1173_v22 = vrot.slane %v1159_v8, %v4856_v50  ;;  %v1234_v23 = vrot.slane %v1226_v25, %v4856_v50  ;;  %v1250_v26 = vrot.slane %v1242_v6, %v4856_v50 }
 0x260   : > { %v4921_v27 = vrot.slane %v1562_v9, %v4854_v43  ;;  %v1577_v28 = vrot.slane %v3660_v10, %v4854_v43  ;;  %v1558_v29 = vcombine.low %v1534_v19, %v1550_v20  ;;  %v1559_v30 = vcombine.high %v1534_v19, %v1550_v20 }
 0x261   : > { %v1585_v31 = vrot.slane %v1578_v13, %v4854_v43  ;;  %v1593_v32 = vrot.slane %v3661_v14, %v4854_v43  ;;  %v1182_v33 = vrot.slane %v1174_v15, %v4856_v50  ;;  %v1189_v34 = vrot.slane %v1175_v16, %v4856_v50 }
 0x262   : > { %v1630_v36 = vpack.c.bf16 %v1558_v29, %v1558_v29  ;;  %v1631_v37 = vpack.c.bf16 %v1559_v30, %v1559_v30  ;;  %v1527_v38 = vcombine.high %v1501_v48, %v1509_v49  ;;  %v1543_v39 = vcombine.high %v1517_v51, %v1525_v52 }
 0x263   : > { %v1262_v40 = vcombine.low %v1166_v21, %v1173_v22  ;;  %v3656_v42 = vcombine.high %v1166_v21, %v1173_v22  ;;  %v1258_v44 = vcombine.low %v1234_v23, %v1250_v26  ;;  %v1259_v45 = vcombine.high %v1234_v23, %v1250_v26 }
 0x264   : > { %v1943_v46 = vsel %vm1938_vm3, %v1630_v36, 0  ;;  %v1989_v47 = vsel %vm1938_vm3, %v1631_v37, 0  ;;  %v1541_v24 = vrot.slane %v1527_v38, %v4856_v50  ;;  %v1557_v53 = vrot.slane %v1543_v39, %v4856_v50 }
 0x265   : > { %v1278_v54 = vcombine.low %v1182_v33, %v1189_v34  ;;  %v3657_v55 = vcombine.high %v1182_v33, %v1189_v34  ;;  %3789 = vmatpush3.bf16.xpose.msra.mxu1 %v1943_v46  ;;  %3795 = vmatpush3.bf16.xpose.msra.mxu0 %v1989_v47  ;;  %v1594_v56 = vcombine.low %v4921_v27, %v1577_v28 }
 0x266   : > { %3800 = vmatprep.subr.bf16.mxu1 %v4369_v3  ;;  %3806 = vmatprep.subr.bf16.mxu0 %v4369_v3  ;;  %v1560_v48 = vcombine.low %v1541_v24, %v1557_v53  ;;  %v1561_v49 = vcombine.high %v1541_v24, %v1557_v53  ;;  %v1610_v51 = vcombine.low %v1585_v31, %v1593_v32 }
 0x267   : > { %v1602_v58 = vrot.slane %v1594_v56, %v4856_v50  ;;  %v1269_v60 = vrot.slane %v1262_v40, %v4854_v43  ;;  %v1277_v61 = vrot.slane %v3656_v42, %v4854_v43  ;;  %v1330_v62 = vpack.c.bf16 %v1258_v44, %v1258_v44 }
 0x268   : > { %v1632_v52 = vpack.c.bf16 %v1560_v48, %v1560_v48  ;;  %v1633_v57 = vpack.c.bf16 %v1561_v49, %v1561_v49  ;;  %v1618_v59 = vrot.slane %v1610_v51, %v4856_v50  ;;  %v1331_v63 = vpack.c.bf16 %v1259_v45, %v1259_v45 }
 0x269   : > { %v1285_v0 = vrot.slane %v1278_v54, %v4854_v43  ;;  %v1293_v1 = vrot.slane %v3657_v55, %v4854_v43  ;;  %v1241_v2 = vrot.slane %v1227_v17, %v4856_v50  ;;  %v1257_v4 = vrot.slane %v1243_v18, %v4856_v50 }
 0x26a   : > { %v1595_v5 = vcombine.high %v4921_v27, %v1577_v28  ;;  %v1611_v25 = vcombine.high %v1585_v31, %v1593_v32  ;;  %v2035_v6 = vsel %vm1938_vm3, %v1632_v52, 0  ;;  %v2081_v7 = vsel %vm1938_vm3, %v1633_v57, 0 }
 0x26b   : > { %v1626_v8 = vcombine.low %v1602_v58, %v1618_v59  ;;  %v1627_v9 = vcombine.high %v1602_v58, %v1618_v59  ;;  %v1294_v10 = vcombine.low %v1269_v60, %v1277_v61  ;;  %v1310_v11 = vcombine.low %v1285_v0, %v1293_v1 }
 0x26c   : > { %3791 = vmatmul.mubr.msk.bf16.vlgmr.msra.gmra.mrb[4].mxu1 %vm1938_vm3, %v1330_v62  ;;  %3797 = vmatmul.mubr.msk.bf16.vlgmr.msra.gmra.mrb[8].mxu0 %vm1938_vm3, %v1331_v63  ;;  %v1260_v12 = vcombine.low %v1241_v2, %v1257_v4  ;;  %v1261_v13 = vcombine.high %v1241_v2, %v1257_v4  ;;  %v1609_v16 = vrot.slane %v1595_v5, %v4856_v50 }
 0x26d   : > { %3801 = vmatpush3.bf16.xpose.msra.mxu1 %v2035_v6  ;;  %3807 = vmatpush3.bf16.xpose.msra.mxu0 %v2081_v7  ;;  %v1634_v14 = vpack.c.bf16 %v1626_v8, %v1626_v8  ;;  %v1635_v15 = vpack.c.bf16 %v1627_v9, %v1627_v9  ;;  %v1625_v17 = vrot.slane %v1611_v25, %v4856_v50 }
 0x26e   : > { %3802 = vmatprep.mubr.msk.bf16.mxu1 %vm4370_vm1, %v4369_v3  ;;  %3808 = vmatprep.mubr.msk.bf16.mxu0 %vm4370_vm1, %v4369_v3  ;;  %v1332_v18 = vpack.c.bf16 %v1260_v12, %v1260_v12  ;;  %v1333_v19 = vpack.c.bf16 %v1261_v13, %v1261_v13  ;;  %v1302_v20 = vrot.slane %v1294_v10, %v4856_v50 }
 0x26f   : > { %3812 = vmatprep.subr.bf16.mxu1 %v4369_v3  ;;  %3818 = vmatprep.subr.bf16.mxu0 %v4369_v3  ;;  %v1318_v21 = vrot.slane %v1310_v11, %v4856_v50  ;;  %v2127_v22 = vsel %vm1938_vm3, %v1634_v14, 0  ;;  %v2173_v23 = vsel %vm1938_vm3, %v1635_v15, 0  ;;  %v1628_v26 = vcombine.low %v1609_v16, %v1625_v17 }
 0x270   : > { %v1629_v27 = vcombine.high %v1609_v16, %v1625_v17  ;;  %v1295_v28 = vcombine.high %v1269_v60, %v1277_v61  ;;  %v1311_v29 = vcombine.high %v1285_v0, %v1293_v1 }
 0x271   : > { %v1326_v30 = vcombine.low %v1302_v20, %v1318_v21  ;;  %v1327_v31 = vcombine.high %v1302_v20, %v1318_v21  ;;  %v1636_v32 = vpack.c.bf16 %v1628_v26, %v1628_v26 }
 0x272   : > { %v1637_v33 = vpack.c.bf16 %v1629_v27, %v1629_v27  ;;  %v1309_v37 = vrot.slane %v1295_v28, %v4856_v50  ;;  %v1325_v38 = vrot.slane %v1311_v29, %v4856_v50 }
 0x273   : > { %v1334_v34 = vpack.c.bf16 %v1326_v30, %v1326_v30  ;;  %v1335_v36 = vpack.c.bf16 %v1327_v31, %v1327_v31  ;;  %v2219_v39 = vsel %vm1938_vm3, %v1636_v32, 0 }
 0x274   : > { %3803 = vmatmul.mubr.msk.bf16.vlgmr.msra.gmra.mrb[8].mxu1 %vm1938_vm3, %v1332_v18  ;;  %3809 = vmatmul.mubr.msk.bf16.vlgmr.msra.gmra.mrb[12].mxu0 %vm1938_vm3, %v1333_v19  ;;  %v2265_v40 = vsel %vm1938_vm3, %v1637_v33, 0  ;;  %v1328_v42 = vcombine.low %v1309_v37, %v1325_v38  ;;  %v1329_v44 = vcombine.high %v1309_v37, %v1325_v38  ;;  %v1641_v33 = vpop.permute.xlu1 %1640 }
 0x275   : > { %3813 = vmatpush3.bf16.xpose.msra.mxu1 %v2127_v22  ;;  %3819 = vmatpush3.bf16.xpose.msra.mxu0 %v2173_v23 }
 0x276   : > { %3814 = vmatprep.mubr.msk.bf16.mxu1 %vm4370_vm1, %v4369_v3  ;;  %3820 = vmatprep.mubr.msk.bf16.mxu0 %vm4370_vm1, %v4369_v3  ;;  %v1336_v45 = vpack.c.bf16 %v1328_v42, %v1328_v42  ;;  %v1337_v46 = vpack.c.bf16 %v1329_v44, %v1329_v44 }
 0x277   : > { %3824 = vmatprep.subr.bf16.mxu1 %v4369_v3  ;;  %3830 = vmatprep.subr.bf16.mxu0 %v4369_v3 }
 0x27c   : > { %3815 = vmatmul.mubr.msk.bf16.vlgmr.msra.gmra.mrb[12].mxu1 %vm1938_vm3, %v1334_v34  ;;  %3821 = vmatmul.mubr.msk.bf16.vlgmr.msra.gmra.mrb[16].mxu0 %vm1938_vm3, %v1335_v36 }
 0x27d   : > { %3825 = vmatpush3.bf16.xpose.msra.mxu1 %v2219_v39  ;;  %3831 = vmatpush3.bf16.xpose.msra.mxu0 %v2265_v40 }
 0x27e   : > { %3826 = vmatprep.mubr.msk.bf16.mxu1 %vm4370_vm1, %v4369_v3  ;;  %3832 = vmatprep.mubr.msk.bf16.mxu0 %vm4370_vm1, %v4369_v3 }
 0x27f   : > { %3836 = vmatprep.subr.bf16.mxu1 %v4369_v3  ;;  %3842 = vmatprep.subr.bf16.mxu0 %v4369_v3 }
 0x284   : > { %3827 = vmatmul.mubr.msk.bf16.vlgmr.msra.gmra.mrb[16].mxu1 %vm1938_vm3, %v1336_v45  ;;  %3833 = vmatmul.mubr.msk.bf16.vlgmr.msra.gmra.mrb[20].mxu0 %vm1938_vm3, %v1337_v46 }
 0x285   : > { %3838 = vmatprep.mubr.msk.bf16.mxu1 %vm4370_vm1, %v4369_v3  ;;  %3844 = vmatprep.mubr.msk.bf16.mxu0 %vm4370_vm1, %v4369_v3 }
 0x33f   : > { %v1979_v47 = vpop.f32.mrb[4].mxu1  ;;  %v2025_v24 = vpop.f32.mrb[8].mxu0 }
 0x340   : > { %v2307_v53 = vmul.f32 0.35355338, %v1979_v47  ;;  %v2308_v54 = vmul.f32 0.35355338, %v2025_v24  ;;  %v3792_v55 = vpop.f32.mrb[5].mxu1  ;;  %v3798_v56 = vpop.f32.mrb[9].mxu0 }
 0x341   : > { %v1982_v48 = vpop.f32.mrb[6].mxu1  ;;  %v2028_v49 = vpop.f32.mrb[10].mxu0 }
 0x342   : > { %v3793_v51 = vpop.f32.mrb[7].mxu1  ;;  %v3799_v52 = vpop.f32.mrb[11].mxu0  ;;  %v2315_v57 = vsel %vm1938_vm3, %v2307_v53, -inf  ;;  %v2318_v58 = vsel %vm1938_vm3, %v2308_v54, -inf }
 0x343   : > { %2316 = vmax.xlane.f32.xlu0 %v2315_v57  ;;  %2319 = vmax.xlane.f32.xlu1 %v2318_v58 }
 0x347   : > { %v2071_v59 = vpop.f32.mrb[8].mxu1  ;;  %v2117_v60 = vpop.f32.mrb[12].mxu0 }
 0x348   : > { %v2309_v61 = vmul.f32 0.35355338, %v2071_v59  ;;  %v3804_v62 = vpop.f32.mrb[9].mxu1  ;;  %v3810_v63 = vpop.f32.mrb[13].mxu0  ;;  %v2310_v2 = vmul.f32 0.35355338, %v2117_v60 }
 0x349   : > { %v2074_v0 = vpop.f32.mrb[10].mxu1  ;;  %v2120_v1 = vpop.f32.mrb[14].mxu0 }
 0x34a   : > { %v3805_v4 = vpop.f32.mrb[11].mxu1  ;;  %v3811_v5 = vpop.f32.mrb[15].mxu0  ;;  %v2321_v25 = vsel %vm1938_vm3, %v2309_v61, -inf  ;;  %v2324_v6 = vsel %vm1938_vm3, %v2310_v2, -inf }
 0x34b   : > { %2322 = vmax.xlane.f32.xlu0 %v2321_v25 }
 0x34f   : > { %v2163_v7 = vpop.f32.mrb[12].mxu1  ;;  %2325 = vmax.xlane.f32.xlu0 %v2324_v6  ;;  %v2209_v8 = vpop.f32.mrb[16].mxu0 }
 0x350   : > { %v2311_v9 = vmul.f32 0.35355338, %v2163_v7  ;;  %v4990_v10 = vmul.f32 0.35355338, %v2209_v8  ;;  %v3816_v11 = vpop.f32.mrb[13].mxu1  ;;  %v3822_v12 = vpop.f32.mrb[17].mxu0 }
 0x351   : > { %v2166_v13 = vpop.f32.mrb[14].mxu1  ;;  %v2212_v14 = vpop.f32.mrb[18].mxu0 }
 0x352   : > { %v3817_v15 = vpop.f32.mrb[15].mxu1  ;;  %v3823_v16 = vpop.f32.mrb[19].mxu0  ;;  %v2327_v17 = vsel %vm1938_vm3, %v2311_v9, -inf  ;;  %v2330_v18 = vsel %vm1938_vm3, %v4990_v10, -inf }
 0x353   : > { %2328 = vmax.xlane.f32.xlu1 %v2327_v17  ;;  %2331 = vmax.xlane.f32.xlu0 %v2330_v18 }
 0x357   : > { %v2255_v19 = vpop.f32.mrb[16].mxu1  ;;  %v2301_v20 = vpop.f32.mrb[20].mxu0 }
 0x358   : > { %v4995_v21 = vmul.f32 0.35355338, %v2255_v19  ;;  %v4997_v22 = vmul.f32 0.35355338, %v2301_v20  ;;  %v3828_v23 = vpop.f32.mrb[17].mxu1  ;;  %v3834_v26 = vpop.f32.mrb[21].mxu0 }
 0x359   : > { %v2258_v27 = vpop.f32.mrb[18].mxu1  ;;  %v2304_v28 = vpop.f32.mrb[22].mxu0 }
 0x35a   : > { %v3829_v29 = vpop.f32.mrb[19].mxu1  ;;  %v3835_v30 = vpop.f32.mrb[23].mxu0  ;;  %v2333_v31 = vsel %vm1938_vm3, %v4995_v21, -inf  ;;  %v2336_v32 = vsel %vm1938_vm3, %v4997_v22, -inf }
 0x35b   : > { %2334 = vmax.xlane.f32.xlu1 %v2333_v31  ;;  %2337 = vmax.xlane.f32.xlu0 %v2336_v32 }
 0x36c   : > { %1652 = vrot.lane.b32.xlu1 %v4848_v35, %s4371_s5 }
 0x371   : > { %1646 = vrot.lane.b32.xlu0 %v4848_v35, %s4373_s15 }
 0x3d0   : > { %v2317_v34 = vpop.xlane.xlu0 %2316  ;;  %v2320_v36 = vpop.xlane.xlu1 %2319 }
 0x3d1   : > { %v2339_v37 = vsub.f32 %v2307_v53, %v2317_v34  ;;  %v2340_v38 = vsub.f32 %v2308_v54, %v2320_v36 }
 0x3d3   : > { %v2347_v39 = vmul.f32 1.442695, %v2339_v37  ;;  %v2349_v40 = vmul.f32 1.442695, %v2340_v38 }
 0x3d5   : > { %4049 = vpow2.f32 %v2347_v39 }
 0x3d6   : > { %4051 = vpow2.f32 %v2349_v40 }
 0x3d8   : > { %v2323_v42 = vpop.xlane.xlu0 %2322 }
 0x3d9   : > { %v2341_v44 = vsub.f32 %v2309_v61, %v2323_v42 }
 0x3db   : > { %v2351_v45 = vmul.f32 1.442695, %v2341_v44 }
 0x3dc   : > { %v2326_v46 = vpop.xlane.xlu0 %2325 }
 0x3dd   : > { %4053 = vpow2.f32 %v2351_v45  ;;  %v2342_v47 = vsub.f32 %v2310_v2, %v2326_v46 }
 0x3df   : > { %v5007_v24 = vpop.eup %4049  ;;  %v2353_v55 = vmul.f32 1.442695, %v2342_v47 }
 0x3e0   : > { %v5009_v56 = vpop.eup %4051  ;;  %v2329_v48 = vpop.xlane.xlu1 %2328  ;;  %v2363_v53 = vsel %vm1938_vm3, %v5007_v24, 0.0 }
 0x3e1   : > { %4055 = vpow2.f32 %v2353_v55  ;;  %v2343_v54 = vsub.f32 %v2311_v9, %v2329_v48  ;;  %2364 = vadd.xlane.f32.xlu1 %v2363_v53  ;;  %v2366_v49 = vsel %vm1938_vm3, %v5009_v56, 0.0  ;;  %v5015_v52 = vpop.xlane.xlu0 %2331 }
 0x3e2   : > { %2367 = vadd.xlane.f32.xlu0 %v2366_v49  ;;  %v2344_v53 = vsub.f32 %v4990_v10, %v5015_v52 }
 0x3e3   : > { %v2355_v51 = vmul.f32 1.442695, %v2343_v54 }
 0x3e4   : > { %v2357_v54 = vmul.f32 1.442695, %v2344_v53 }
 0x3e5   : > { %4057 = vpow2.f32 %v2355_v51 }
 0x3e6   : > { %4059 = vpow2.f32 %v2357_v54 }
 0x3e7   : > { %v5017_v57 = vpop.eup %4053 }
 0x3e8   : > { %v5019_v58 = vpop.xlane.xlu1 %2334  ;;  %v5021_v59 = vpop.xlane.xlu0 %2337  ;;  %v2369_v60 = vsel %vm1938_vm3, %v5017_v57, 0.0 }
 0x3e9   : > { %2370 = vadd.xlane.f32.xlu1 %v2369_v60  ;;  %v2345_v49 = vsub.f32 %v4995_v21, %v5019_v58  ;;  %v2346_v10 = vsub.f32 %v4997_v22, %v5021_v59 }
 0x3eb   : > { %v5025_v61 = vpop.eup %4055  ;;  %v2359_v51 = vmul.f32 1.442695, %v2345_v49  ;;  %v2361_v21 = vmul.f32 1.442695, %v2346_v10 }
 0x3ec   : > { %v1653_v62 = vpop.permute.xlu1 %1652  ;;  %v1647_v63 = vpop.permute.xlu0 %1646  ;;  %v2372_v0 = vsel %vm1938_vm3, %v5025_v61, 0.0 }
 0x3ed   : > { %v1674_v1 = vcombine.low %v1641_v33, %v1653_v62  ;;  %v1675_v2 = vcombine.high %v1641_v33, %v1653_v62  ;;  %v1658_v4 = vcombine.low %v4848_v35, %v1647_v63  ;;  %2373 = vadd.xlane.f32.xlu0 %v2372_v0  ;;  %v1659_v5 = vcombine.high %v4848_v35, %v1647_v63 }
 0x3ee   : > { %4061 = vpow2.f32 %v2359_v51 }
 0x3ef   : > { %v5031_v25 = vpop.eup %4057  ;;  %v1682_v6 = vrot.slane %v1674_v1, %v4854_v43  ;;  %v1689_v7 = vrot.slane %v1675_v2, %v4854_v43  ;;  %v1666_v8 = vrot.slane %v1658_v4, %v4854_v43  ;;  %v1673_v9 = vrot.slane %v1659_v5, %v4854_v43 }
 0x3f0   : > { %v2375_v11 = vsel %vm1938_vm3, %v5031_v25, 0.0  ;;  %v5063_v60 = vpop.eup %4059  ;;  %4063 = vpow2.f32 %v2361_v21 }
 0x3f1   : > { %v1690_v12 = vcombine.low %v1666_v8, %v1682_v6  ;;  %v1691_v13 = vcombine.high %v1666_v8, %v1682_v6  ;;  %2376 = vadd.xlane.f32.xlu0 %v2375_v11  ;;  %v1706_v14 = vcombine.low %v1673_v9, %v1689_v7  ;;  %v1707_v15 = vcombine.high %v1673_v9, %v1689_v7 }
 0x3f2   : > { %v2378_v62 = vsel %vm1938_vm3, %v5063_v60, 0.0 }
 0x3f3   : > { %v1698_v35 = vrot.slane %v1690_v12, %v4856_v50  ;;  %v1705_v16 = vrot.slane %v1691_v13, %v4856_v50  ;;  %v1714_v17 = vrot.slane %v1706_v14, %v4856_v50  ;;  %v1721_v18 = vrot.slane %v1707_v15, %v4856_v50 }
 0x3f5   : > { %v1794_v19 = vcombine.low %v1698_v35, %v1705_v16  ;;  %v3662_v20 = vcombine.high %v1698_v35, %v1705_v16  ;;  %v1810_v23 = vcombine.low %v1714_v17, %v1721_v18  ;;  %v3663_v26 = vcombine.high %v1714_v17, %v1721_v18 }
 0x3f7   : > { %v1801_v27 = vrot.slane %v1794_v19, %v4854_v43  ;;  %v1809_v28 = vrot.slane %v3662_v20, %v4854_v43  ;;  %v1817_v29 = vrot.slane %v1810_v23, %v4854_v43  ;;  %v1825_v30 = vrot.slane %v3663_v26, %v4854_v43 }
 0x3f8   : > { %v5067_v63 = vpop.eup %4061 }
 0x3f9   : > { %v1826_v31 = vcombine.low %v1801_v27, %v1809_v28  ;;  %v1827_v32 = vcombine.high %v1801_v27, %v1809_v28  ;;  %v1842_v33 = vcombine.low %v1817_v29, %v1825_v30  ;;  %v1843_v34 = vcombine.high %v1817_v29, %v1825_v30 }
 0x3fa   : > { %1648 = vrot.lane.b32.xlu1 %v4852_v41, %s4373_s15  ;;  %v2381_v0 = vsel %vm1938_vm3, %v5067_v63, 0.0  ;;  %v5075_v52 = vpop.eup %4063 }
 0x3fb   : > { %v1834_v36 = vrot.slane %v1826_v31, %v4856_v50  ;;  %v1841_v37 = vrot.slane %v1827_v32, %v4856_v50  ;;  %v1850_v38 = vrot.slane %v1842_v33, %v4856_v50  ;;  %v1857_v39 = vrot.slane %v1843_v34, %v4856_v50 }
 0x3fc   : > { %v2384_v58 = vsel %vm1938_vm3, %v5075_v52, 0.0 }
 0x3fd   : > { %v1858_v40 = vcombine.low %v1834_v36, %v1850_v38  ;;  %v1859_v42 = vcombine.high %v1834_v36, %v1850_v38  ;;  %v1860_v44 = vcombine.low %v1841_v37, %v1857_v39  ;;  %v1861_v45 = vcombine.high %v1841_v37, %v1857_v39 }
 0x3ff   : > { %v1930_v46 = vpack.c.bf16 %v1858_v40, %v1858_v40  ;;  %v1931_v47 = vpack.c.bf16 %v1859_v42, %v1859_v42  ;;  %v1932_v22 = vpack.c.bf16 %v1860_v44, %v1860_v44  ;;  %v1933_v9 = vpack.c.bf16 %v1861_v45, %v1861_v45 }
 0x401   : > { %v2416_v55 = vsel %vm2414_vm4, %v1930_v46, 0  ;;  %v2462_v48 = vsel %vm2414_vm4, %v1931_v47, 0  ;;  %v2508_v13 = vsel %vm2414_vm4, %v1932_v22, 0  ;;  %v2554_v14 = vsel %vm2414_vm4, %v1933_v9, 0 }
 0x402   : > { %3837 = vmatpush3.bf16.msra.mxu1 %v2416_v55  ;;  %3843 = vmatpush3.bf16.msra.mxu0 %v2462_v48 }
 0x403   : > { %3848 = vmatprep.subr.bf16.mxu1 %v4369_v3  ;;  %3854 = vmatprep.subr.bf16.mxu0 %v4369_v3 }
 0x407   : > { %1642 = vrot.lane.b32.xlu0 %v4852_v41, %s4372_s4 }
 0x41e   : > { %2379 = vadd.xlane.f32.xlu1 %v2378_v62 }
 0x426   : > { %2382 = vadd.xlane.f32.xlu0 %v2381_v0 }
 0x42f   : > { %1654 = vrot.lane.b32.xlu1 %v4852_v41, %s4371_s5 }
 0x453   : > { %2385 = vadd.xlane.f32.xlu1 %v2384_v58 }
 0x46e   : > { %v2365_v1 = vpop.xlane.xlu1 %2364 }
 0x46f   : > { %4065 = vrcp.f32 %v2365_v1  ;;  %v2368_v2 = vpop.xlane.xlu0 %2367 }
 0x470   : > { %4067 = vrcp.f32 %v2368_v2 }
 0x476   : > { %v2371_v4 = vpop.xlane.xlu1 %2370 }
 0x477   : > { %4069 = vrcp.f32 %v2371_v4 }
 0x479   : > { %v4066_v5 = vpop.eup %4065 }
 0x47a   : > { %v4068_v6 = vpop.eup %4067  ;;  %v2395_v7 = vmul.f32 %v4066_v5, %v5007_v24  ;;  %v2374_v8 = vpop.xlane.xlu0 %2373 }
 0x47b   : > { %v2396_v59 = vmul.f32 %v4068_v6, %v5009_v56  ;;  %4071 = vrcp.f32 %v2374_v8  ;;  %v1649_v18 = vpop.permute.xlu1 %1648 }
 0x47c   : > { %v2403_v11 = vpack.c.bf16 %v2395_v7, %v2395_v7  ;;  %v1726_v20 = vcombine.low %v4852_v41, %v1649_v18  ;;  %v1727_v23 = vcombine.high %v4852_v41, %v1649_v18 }
 0x47d   : > { %v2404_v12 = vpack.c.bf16 %v2396_v59, %v2396_v59 }
 0x47e   : > { %3839 = vmatmul.mubr.msk.bf16.vlgmr.msra.gmra.mrb[20].mxu1 %vm1938_vm3, %v2403_v11  ;;  %v2377_v19 = vpop.xlane.xlu0 %2376  ;;  %v1734_v29 = vrot.slane %v1726_v20, %v4854_v43  ;;  %v1741_v30 = vrot.slane %v1727_v23, %v4854_v43 }
 0x47f   : > { %3845 = vmatmul.mubr.msk.bf16.vlgmr.msra.gmra.mrb[24].mxu0 %vm1938_vm3, %v2404_v12  ;;  %3849 = vmatpush3.bf16.msra.mxu1 %v2508_v13  ;;  %4073 = vrcp.f32 %v2377_v19 }
 0x480   : > { %3855 = vmatpush3.bf16.msra.mxu0 %v2554_v14  ;;  %3850 = vmatprep.mubr.msk.bf16.mxu1 %vm4370_vm1, %v4369_v3 }
 0x481   : > { %v4070_v24 = vpop.eup %4069  ;;  %3856 = vmatprep.mubr.msk.bf16.mxu0 %vm4370_vm1, %v4369_v3  ;;  %3860 = vmatprep.subr.bf16.mxu1 %v4369_v3 }
 0x482   : > { %v2397_v56 = vmul.f32 %v4070_v24, %v5017_v57  ;;  %3866 = vmatprep.subr.bf16.mxu0 %v4369_v3  ;;  %v1643_v26 = vpop.permute.xlu0 %1642 }
 0x484   : > { %v2405_v15 = vpack.c.bf16 %v2397_v56, %v2397_v56 }
 0x485   : > { %v4072_v35 = vpop.eup %4071 }
 0x486   : > { %v2398_v16 = vmul.f32 %v4072_v35, %v5025_v61  ;;  %3851 = vmatmul.mubr.msk.bf16.vlgmr.msra.gmra.mrb[24].mxu1 %vm1938_vm3, %v2405_v15 }
 0x487   : > { %3862 = vmatprep.mubr.msk.bf16.mxu1 %vm4370_vm1, %v4369_v3 }
 0x488   : > { %v2406_v17 = vpack.c.bf16 %v2398_v16, %v2398_v16 }
 0x489   : > { %v4074_v10 = vpop.eup %4073 }
 0x48a   : > { %3857 = vmatmul.mubr.msk.bf16.vlgmr.msra.gmra.mrb[28].mxu0 %vm1938_vm3, %v2406_v17  ;;  %v2399_v22 = vmul.f32 %v4074_v10, %v5031_v25 }
 0x48b   : > { %3868 = vmatprep.mubr.msk.bf16.mxu0 %vm4370_vm1, %v4369_v3 }
 0x48c   : > { %v2407_v56 = vpack.c.bf16 %v2399_v22, %v2399_v22 }
 0x4ab   : > { %v2380_v57 = vpop.xlane.xlu1 %2379 }
 0x4ac   : > { %4075 = vrcp.f32 %v2380_v57 }
 0x4af   : > { %v1655_v61 = vpop.permute.xlu1 %1654 }
 0x4b0   : > { %v1742_v27 = vcombine.low %v1643_v26, %v1655_v61  ;;  %v1743_v28 = vcombine.high %v1643_v26, %v1655_v61 }
 0x4b2   : > { %v1750_v31 = vrot.slane %v1742_v27, %v4854_v43  ;;  %v1757_v32 = vrot.slane %v1743_v28, %v4854_v43 }
 0x4b3   : > { %v2383_v54 = vpop.xlane.xlu0 %2382 }
 0x4b4   : > { %v1758_v33 = vcombine.low %v1734_v29, %v1750_v31  ;;  %v1759_v34 = vcombine.high %v1734_v29, %v1750_v31  ;;  %v1774_v36 = vcombine.low %v1741_v30, %v1757_v32  ;;  %v1775_v37 = vcombine.high %v1741_v30, %v1757_v32 }
 0x4b5   : > { %4077 = vrcp.f32 %v2383_v54 }
 0x4b6   : > { %v1766_v41 = vrot.slane %v1758_v33, %v4856_v50  ;;  %v1773_v38 = vrot.slane %v1759_v34, %v4856_v50  ;;  %v1782_v39 = vrot.slane %v1774_v36, %v4856_v50  ;;  %v1789_v40 = vrot.slane %v1775_v37, %v4856_v50  ;;  %v4076_v4 = vpop.eup %4075 }
 0x4b7   : > { %v2400_v59 = vmul.f32 %v4076_v4, %v5063_v60 }
 0x4b8   : > { %v1862_v42 = vcombine.low %v1766_v41, %v1773_v38  ;;  %v3664_v44 = vcombine.high %v1766_v41, %v1773_v38  ;;  %v1878_v45 = vcombine.low %v1782_v39, %v1789_v40  ;;  %v3665_v46 = vcombine.high %v1782_v39, %v1789_v40 }
 0x4b9   : > { %v2408_v15 = vpack.c.bf16 %v2400_v59, %v2400_v59 }
 0x4ba   : > { %v1869_v47 = vrot.slane %v1862_v42, %v4854_v43  ;;  %v1877_v55 = vrot.slane %v3664_v44, %v4854_v43  ;;  %v1885_v48 = vrot.slane %v1878_v45, %v4854_v43  ;;  %v1893_v53 = vrot.slane %v3665_v46, %v4854_v43 }
 0x4bc   : > { %v1894_v49 = vcombine.low %v1869_v47, %v1877_v55  ;;  %v1910_v51 = vcombine.low %v1885_v48, %v1893_v53  ;;  %v1895_v62 = vcombine.high %v1869_v47, %v1877_v55  ;;  %v1911_v0 = vcombine.high %v1885_v48, %v1893_v53 }
 0x4be   : > { %v1902_v21 = vrot.slane %v1894_v49, %v4856_v50  ;;  %v1918_v58 = vrot.slane %v1910_v51, %v4856_v50  ;;  %v1909_v1 = vrot.slane %v1895_v62, %v4856_v50  ;;  %v1925_v2 = vrot.slane %v1911_v0, %v4856_v50 }
 0x4bf   : > { %v4078_v35 = vpop.eup %4077 }
 0x4c0   : > { %v1926_v5 = vcombine.low %v1902_v21, %v1918_v58  ;;  %v1927_v6 = vcombine.high %v1902_v21, %v1918_v58  ;;  %v1928_v7 = vcombine.low %v1909_v1, %v1925_v2  ;;  %v1929_v8 = vcombine.high %v1909_v1, %v1925_v2 }
 0x4c1   : > { %v2401_v16 = vmul.f32 %v4078_v35, %v5067_v63 }
 0x4c2   : > { %v1934_v9 = vpack.c.bf16 %v1926_v5, %v1926_v5  ;;  %v1935_v11 = vpack.c.bf16 %v1927_v6, %v1927_v6  ;;  %v1936_v14 = vpack.c.bf16 %v1928_v7, %v1928_v7  ;;  %v1937_v24 = vpack.c.bf16 %v1929_v8, %v1929_v8 }
 0x4c3   : > { %v2409_v17 = vpack.c.bf16 %v2401_v16, %v2401_v16 }
 0x4c4   : > { %v2600_v12 = vsel %vm2414_vm4, %v1934_v9, 0  ;;  %v2646_v13 = vsel %vm2414_vm4, %v1935_v11, 0  ;;  %v2692_v25 = vsel %vm2414_vm4, %v1936_v14, 0  ;;  %v2738_v60 = vsel %vm2414_vm4, %v1937_v24, 0 }
 0x4c5   : > { %3861 = vmatpush3.bf16.msra.mxu1 %v2600_v12  ;;  %3867 = vmatpush3.bf16.msra.mxu0 %v2646_v13 }
 0x4c6   : > { %3872 = vmatprep.subr.bf16.mxu1 %v4369_v3  ;;  %3878 = vmatprep.subr.bf16.mxu0 %v4369_v3 }
 0x4c8   : > { %3863 = vmatmul.mubr.msk.bf16.vlgmr.msra.gmra.mrb[28].mxu1 %vm1938_vm3, %v2407_v56  ;;  %3869 = vmatmul.mubr.msk.bf16.vlgmr.msra.gmra.mrb[32].mxu0 %vm1938_vm3, %v2408_v15 }
 0x4c9   : > { %3873 = vmatpush3.bf16.msra.mxu1 %v2692_v25  ;;  %3879 = vmatpush3.bf16.msra.mxu0 %v2738_v60 }
 0x4ca   : > { %3874 = vmatprep.mubr.msk.bf16.mxu1 %vm4370_vm1, %v4369_v3  ;;  %3880 = vmatprep.mubr.msk.bf16.mxu0 %vm4370_vm1, %v4369_v3 }
 0x4cb   : > { %3884 = vmatprep.subr.bf16.mxu1 %v4369_v3  ;;  %3892 = vmatprep.subr.bf16.mxu0 %v4369_v3 }
 0x4d0   : > { %3875 = vmatmul.mubr.msk.bf16.vlgmr.msra.gmra.mrb[32].mxu1 %vm1938_vm3, %v2409_v17 }
 0x4d1   : > { %3888 = vmatprep.mubr.msk.bf16.mxu1 %vm4370_vm1, %v4369_v3 }
 0x4e0   : > { %v2386_v18 = vpop.xlane.xlu1 %2385 }
 0x4e1   : > { %4079 = vrcp.f32 %v2386_v18 }
 0x4eb   : > { %v4080_v19 = vpop.eup %4079 }
 0x4ec   : > { %v2402_v63 = vmul.f32 %v4080_v19, %v5075_v52 }
 0x4ee   : > { %v2410_v57 = vpack.c.bf16 %v2402_v63, %v2402_v63 }
 0x4f0   : > { %3881 = vmatmul.mubr.msk.bf16.vlgmr.msra.gmra.mrb[36].mxu0 %vm1938_vm3, %v2410_v57 }
 0x4f1   : > { %3896 = vmatprep.mubr.msk.bf16.mxu0 %vm4370_vm1, %v4369_v3 }
 0x551   : > { %v2452_v20 = vpop.f32.mrb[20].mxu1 }
 0x552   : > { %v2498_v23 = vpop.f32.mrb[24].mxu0  ;;  %v3840_v26 = vpop.f32.mrb[21].mxu1 }
 0x553   : > { %v3846_v61 = vpop.f32.mrb[25].mxu0  ;;  %v2455_v27 = vpop.f32.mrb[22].mxu1 }
 0x554   : > { %v2501_v28 = vpop.f32.mrb[26].mxu0  ;;  %v3841_v29 = vpop.f32.mrb[23].mxu1 }
 0x555   : > { %v3847_v30 = vpop.f32.mrb[27].mxu0 }
 0x559   : > { %v2544_v31 = vpop.f32.mrb[24].mxu1 }
 0x55a   : > { %v2780_v32 = vcombine.low %v2452_v20, %v2544_v31  ;;  %v2781_v33 = vcombine.high %v2452_v20, %v2544_v31  ;;  %v3852_v34 = vpop.f32.mrb[25].mxu1 }
 0x55b   : > { %v2547_v36 = vpop.f32.mrb[26].mxu1 }
 0x55c   : > { %v3853_v52 = vpop.f32.mrb[27].mxu1  ;;  %v2788_v42 = vrot.slane %v2780_v32, %v4854_v43  ;;  %v2795_v44 = vrot.slane %v2781_v33, %v4854_v43 }
 0x55d   : > { %v2590_v37 = vpop.f32.mrb[28].mxu0 }
 0x55e   : > { %v2796_v41 = vcombine.low %v2498_v23, %v2590_v37  ;;  %v2797_v38 = vcombine.high %v2498_v23, %v2590_v37  ;;  %v3858_v39 = vpop.f32.mrb[29].mxu0 }
 0x55f   : > { %v2593_v40 = vpop.f32.mrb[30].mxu0 }
 0x560   : > { %v2804_v45 = vrot.slane %v2796_v41, %v4854_v43  ;;  %v2811_v46 = vrot.slane %v2797_v38, %v4854_v43  ;;  %v3859_v47 = vpop.f32.mrb[31].mxu0 }
 0x562   : > { %v2812_v55 = vcombine.low %v2788_v42, %v2804_v45  ;;  %v2813_v48 = vcombine.high %v2788_v42, %v2804_v45  ;;  %v2828_v53 = vcombine.low %v2795_v44, %v2811_v46  ;;  %v2829_v54 = vcombine.high %v2795_v44, %v2811_v46 }
 0x564   : > { %v2820_v49 = vrot.slane %v2812_v55, %v4856_v50  ;;  %v2827_v51 = vrot.slane %v2813_v48, %v4856_v50  ;;  %v2836_v62 = vrot.slane %v2828_v53, %v4856_v50  ;;  %v2843_v0 = vrot.slane %v2829_v54, %v4856_v50  ;;  %v4041_v54 = vld [vmem:[%s4733_s26] sm:$0xff]  }
 0x565   : > { %3885 = vmatpush3.bf16.msra.mxu1 %v4041_v54 }
 0x566   : > { %v2916_v10 = vcombine.low %v2820_v49, %v2827_v51  ;;  %v3682_v21 = vcombine.high %v2820_v49, %v2827_v51  ;;  %v2932_v58 = vcombine.low %v2836_v62, %v2843_v0  ;;  %v3683_v1 = vcombine.high %v2836_v62, %v2843_v0  ;;  %3886 = vmatprep.subr.bf16.mxu1 %v4369_v3 }
 0x568   : > { %v2923_v2 = vrot.slane %v2916_v10, %v4854_v43  ;;  %v2931_v4 = vrot.slane %v3682_v21, %v4854_v43  ;;  %v2939_v5 = vrot.slane %v2932_v58, %v4854_v43  ;;  %v2947_v6 = vrot.slane %v3683_v1, %v4854_v43 }
 0x56a   : > { %v2949_v7 = vcombine.high %v2923_v2, %v2931_v4  ;;  %v2965_v8 = vcombine.high %v2939_v5, %v2947_v6  ;;  %v2948_v22 = vcombine.low %v2923_v2, %v2931_v4  ;;  %v2964_v59 = vcombine.low %v2939_v5, %v2947_v6 }
 0x56c   : > { %v5154_v9 = vrot.slane %v2949_v7, %v4856_v50  ;;  %v5157_v11 = vrot.slane %v2965_v8, %v4856_v50  ;;  %v5160_v12 = vrot.slane %v2948_v22, %v4856_v50  ;;  %v5163_v13 = vrot.slane %v2964_v59, %v4856_v50  ;;  %v4042_v7 = vld [vmem:[%s4733_s26 + $0x8] sm:$0xff]   ;;  %s5363_s26 = scalar_lea.vmem [#allocation10], %s4724_s22 }
 0x56d   : > { %3887 = vmatpush3.bf16.msra.mxu1 %v4042_v7 }
 0x56e   : > { %v2982_v14 = vcombine.low %v5154_v9, %v5157_v11  ;;  %v2980_v24 = vcombine.low %v5160_v12, %v5163_v13  ;;  %v2981_v56 = vcombine.high %v5160_v12, %v5163_v13  ;;  %v2983_v15 = vcombine.high %v5154_v9, %v5157_v11  ;;  %3900 = vmatprep.subr.bf16.mxu1 %v4369_v3  ;;  %v3686_v12 = vld [vmem:[%s5363_s26] ss:$0 sm:$0xff] }
 0x59b   : > { %v2636_v35 = vpop.f32.mrb[28].mxu1  ;;  %v2682_v25 = vpop.f32.mrb[32].mxu0 }
 0x59c   : > { %v3864_v60 = vpop.f32.mrb[29].mxu1  ;;  %v3870_v16 = vpop.f32.mrb[33].mxu0 }
 0x59d   : > { %v2639_v17 = vpop.f32.mrb[30].mxu1  ;;  %v2685_v18 = vpop.f32.mrb[34].mxu0 }
 0x59e   : > { %v3865_v19 = vpop.f32.mrb[31].mxu1  ;;  %v3871_v63 = vpop.f32.mrb[35].mxu0 }
 0x5a3   : > { %v2728_v57 = vpop.f32.mrb[32].mxu1 }
 0x5a4   : > { %v2848_v20 = vcombine.low %v2636_v35, %v2728_v57  ;;  %v2849_v23 = vcombine.high %v2636_v35, %v2728_v57  ;;  %v3876_v26 = vpop.f32.mrb[33].mxu1 }
 0x5a5   : > { %v2731_v61 = vpop.f32.mrb[34].mxu1 }
 0x5a6   : > { %v3877_v27 = vpop.f32.mrb[35].mxu1  ;;  %v2856_v33 = vrot.slane %v2848_v20, %v4854_v43  ;;  %v2863_v34 = vrot.slane %v2849_v23, %v4854_v43 }
 0x5c3   : > { %v2774_v28 = vpop.f32.mrb[36].mxu0 }
 0x5c4   : > { %v2864_v29 = vcombine.low %v2682_v25, %v2774_v28  ;;  %v2865_v30 = vcombine.high %v2682_v25, %v2774_v28  ;;  %v3882_v31 = vpop.f32.mrb[37].mxu0 }
 0x5c5   : > { %v2777_v32 = vpop.f32.mrb[38].mxu0  ;;  %v4085_v31 = vld [vmem:[#allocation13] sm:$0xff] }
 0x5c6   : > { %v2872_v36 = vrot.slane %v2864_v29, %v4854_v43  ;;  %v2879_v52 = vrot.slane %v2865_v30, %v4854_v43  ;;  %v3883_v37 = vpop.f32.mrb[39].mxu0 }
 0x5c8   : > { %v2880_v41 = vcombine.low %v2856_v33, %v2872_v36  ;;  %v2881_v38 = vcombine.high %v2856_v33, %v2872_v36  ;;  %v2896_v39 = vcombine.low %v2863_v34, %v2879_v52  ;;  %v2897_v40 = vcombine.high %v2863_v34, %v2879_v52  ;;  %v4086_v34 = vld [vmem:[#allocation13 + $0x8] sm:$0xff] }
 0x5ca   : > { %v2888_v42 = vrot.slane %v2880_v41, %v4856_v50  ;;  %v2895_v44 = vrot.slane %v2881_v38, %v4856_v50  ;;  %v2904_v45 = vrot.slane %v2896_v39, %v4856_v50  ;;  %v2911_v46 = vrot.slane %v2897_v40, %v4856_v50 }
 0x5cc   : > { %v2984_v47 = vcombine.low %v2888_v42, %v2895_v44  ;;  %v3684_v55 = vcombine.high %v2888_v42, %v2895_v44  ;;  %v3000_v48 = vcombine.low %v2904_v45, %v2911_v46  ;;  %v3685_v53 = vcombine.high %v2904_v45, %v2911_v46 }
 0x5ce   : > { %v2991_v49 = vrot.slane %v2984_v47, %v4854_v43  ;;  %v2999_v51 = vrot.slane %v3684_v55, %v4854_v43  ;;  %v3007_v62 = vrot.slane %v3000_v48, %v4854_v43  ;;  %v3015_v0 = vrot.slane %v3685_v53, %v4854_v43  ;;  %v4043_v55 = vld [vmem:[%s4775_s0] sm:$0xff]   ;;  %v4044_v48 = vld [vmem:[%s4775_s0 + $0x8] sm:$0xff]   ;;  %s5364_s0 = scalar_lea.vmem [#allocation11], %s4724_s22 }
 0x5cf   : > { %3893 = vmatpush3.bf16.msra.mxu0 %v4043_v55  ;;  %v4045_v53 = vld [vmem:[%s4789_s19] sm:$0xff]  }
 0x5d0   : > { %v3017_v10 = vcombine.high %v2991_v49, %v2999_v51  ;;  %v3033_v21 = vcombine.high %v3007_v62, %v3015_v0  ;;  %v3016_v58 = vcombine.low %v2991_v49, %v2999_v51  ;;  %v3032_v1 = vcombine.low %v3007_v62, %v3015_v0  ;;  %3894 = vmatprep.subr.bf16.mxu0 %v4369_v3 }
 0x5d2   : > { %v3031_v2 = vrot.slane %v3017_v10, %v4856_v50  ;;  %v3047_v4 = vrot.slane %v3033_v21, %v4856_v50  ;;  %v3024_v5 = vrot.slane %v3016_v58, %v4856_v50  ;;  %v3040_v6 = vrot.slane %v3032_v1, %v4856_v50  ;;  %v3690_v58 = vld [vmem:[%s5364_s0] ss:$0 sm:$0xff] }
 0x5d3   : > { %3895 = vmatpush3.bf16.msra.mxu0 %v4044_v48 }
 0x5d4   : > { %v3050_v8 = vcombine.low %v3031_v2, %v3047_v4  ;;  %v3049_v22 = vcombine.high %v3024_v5, %v3040_v6  ;;  %v3048_v59 = vcombine.low %v3024_v5, %v3040_v6  ;;  %v3051_v43 = vcombine.high %v3031_v2, %v3047_v4  ;;  %v3691_v6 = vld [vmem:[%s811_s24] ss:$0 sm:$0xff] }
 0x5d6   : > { %v4025_v9 = vpack.i.bf16 %v3050_v8, %v2982_v14  ;;  %v4020_v11 = vpack.i.bf16 %v3049_v22, %v2981_v56  ;;  %v4030_v35 = vpack.i.bf16 %v3051_v43, %v2983_v15  ;;  %v4046_v43 = vld [vmem:[%s4789_s19 + $0x8] sm:$0xff]  }
 0x5d8   : > { %4026 = vrot.lane.b32.xlu1 %v4025_v9, %s4376_s13  ;;  %4021 = vrot.lane.b32.xlu0 %v4020_v11, %s4377_s25  ;;  %v4047_v9 = vld [vmem:[%s4789_s19 + $0x10] sm:$0xff]   ;;  %v4048_v11 = vld [vmem:[%s4789_s19 + $0x18] sm:$0xff]  }
 0x5dc   : > { %4031 = vrot.lane.b32.xlu0 %v4030_v35, %s4378_s17  ;;  %v3692_v35 = vld [vmem:[%s819_s6] ss:$0 sm:$0xff]  ;;  %s4379_s6 = smov [#allocation13]  }
 0x5dd   : > { %s3369_s12 = sshll.u32 %s4379_s6, 4  ;;  %s3370_s12 = int_to_ptr.vmem [resolvable:$true] %s3369_s12 }
 0x5de   : > { %s4265_s18 = scalar_lea.vmem %s3370_s12, 256  ;;  %p4272_p7 = scmp.lt.s32.totalorder %s3370_s12, %s3370_s12 }
 0x5df   : > { %p4266_p8 = scmp.ne.s32.totalorder %s3370_s12, %s4265_s18  ;;  %p4273_p9 = scmp.lt.s32.totalorder %s4265_s18, %s4265_s18 }
 0x5e1   : > { %p4267_p3 = pnand %p4266_p8, %p3953_p6  ;;  %p4274_p4 = por %p4273_p9, %p4272_p7 }
 0x5e3   : > { %p4268_p0 = pneg %p4267_p3 }
 0x5e5   : > { %p4275_p5 = pnand %p4274_p4, %p4268_p0 }
 0x64a   : > { %v4027_v25 = vpop.permute.xlu1 %4026  ;;  %v4022_v50 = vpop.permute.xlu0 %4021 }
 0x64b   : > { %v4024_v60 = vunpack.i.h.bf16 %v4022_v50  ;;  %v4023_v16 = vunpack.i.l.bf16 %v4022_v50  ;;  %v4029_v17 = vunpack.i.h.bf16 %v4027_v25  ;;  %v4028_v18 = vunpack.i.l.bf16 %v4027_v25 }
 0x64d   : > { %v3076_v14 = vsel %vm1938_vm3, %v2980_v24, %v4023_v16  ;;  %v3077_v56 = vsel %vm1938_vm3, %v3048_v59, %v4024_v60 }
 0x64e   : > { %v4032_v15 = vpop.permute.xlu0 %4031  ;;  %v3079_v57 = vsel %vm3078_vm5, %v3076_v14, %v4028_v18  ;;  %v3080_v20 = vsel %vm3078_vm5, %v3077_v56, %v4029_v17 }
 0x64f   : > { %v4034_v19 = vunpack.i.h.bf16 %v4032_v15  ;;  %v4033_v63 = vunpack.i.l.bf16 %v4032_v15 }
 0x651   : > { %v3082_v23 = vsel %vm3081_vm6, %v3079_v57, %v4033_v63  ;;  %v3083_v26 = vsel %vm3081_vm6, %v3080_v20, %v4034_v19  ;;  %v3696_v63 = vld [vmem:[%s827_s3] ss:$0 sm:$0xff] }
 0x652   : > { %v3084_v61 = vpack.c.bf16 %v3083_v26, %v3082_v23 }
 0x654   : > { %3889 = vmatmul.mubr.msk.bf16.vlgmr.msra.gmra.mrb[36].mxu1 %vm865_vm2, %v3084_v61 }
 0x655   : > { %3908 = vmatprep.mubr.msk.bf16.mxu1 %vm4370_vm1, %v4369_v3  ;;  %3901 = vmatpush3.bf16.msra.mxu1 %v4045_v53 }
 0x656   : > { %3902 = vmatprep.subr.bf16.mxu1 %v4369_v3 }
 0x659   : > { %3903 = vmatpush3.bf16.msra.mxu1 %v4046_v43 }
 0x65a   : > { %3904 = vmatprep.subr.bf16.mxu1 %v4369_v3 }
 0x65d   : > { %3905 = vmatpush3.bf16.msra.mxu1 %v4047_v9 }
 0x65e   : > { %3906 = vmatprep.subr.bf16.mxu1 %v4369_v3 }
 0x661   : > { %3907 = vmatpush3.bf16.msra.mxu1 %v4048_v11 }
 0x727   : > { %v3145_v13 = vpop.f32.mrb[36].mxu1 }
 0x728   : > { %v3146_v24 = vadd.f32 %v3686_v12, %v3145_v13  ;;  %v3890_v27 = vpop.f32.mrb[37].mxu1 }
 0x729   : > { %v3148_v28 = vpop.f32.mrb[38].mxu1 }
 0x72a   : > { %v3149_v29 = vadd.f32 %v3686_v12, %v3148_v28  ;;  %v3891_v30 = vpop.f32.mrb[39].mxu1  ;;  %v3152_v32 = vadd.f32 %v4085_v31, %v3146_v24 }
 0x72c   : > { %v3154_v33 = vsel %vm865_vm2, %v3152_v32, 0.0  ;;  %v3153_v36 = vadd.f32 %v4086_v34, %v3149_v29 }
 0x72d   : > { %3155 = vadd.xlane.f32.xlu1 %v3154_v33 }
 0x72e   : > { %v3157_v52 = vsel %vm865_vm2, %v3153_v36, 0.0 }
 0x72f   : > { %3158 = vadd.xlane.f32.xlu0 %v3157_v52 }
 0x7ba   : > { %v3156_v37 = vpop.xlane.xlu1 %3155 }
 0x7bb   : > { %v3161_v41 = vmul.f32 0.03125, %v3156_v37 }
 0x7bc   : > { %v3159_v38 = vpop.xlane.xlu0 %3158 }
 0x7bd   : > { %v3163_v39 = vsub.f32 %v3152_v32, %v3161_v41  ;;  %v3162_v40 = vmul.f32 0.03125, %v3159_v38 }
 0x7bf   : > { %v3164_v42 = vsub.f32 %v3153_v36, %v3162_v40  ;;  %v3165_v44 = vmul.f32 %v3163_v39, %v3163_v39 }
 0x7c1   : > { %v3167_v45 = vsel %vm865_vm2, %v3165_v44, 0.0  ;;  %v3166_v46 = vmul.f32 %v3164_v42, %v3164_v42 }
 0x7c2   : > { %3168 = vadd.xlane.f32.xlu0 %v3167_v45 }
 0x7c3   : > { %v3170_v47 = vsel %vm865_vm2, %v3166_v46, 0.0 }
 0x7c4   : > { %3171 = vadd.xlane.f32.xlu1 %v3170_v47 }
 0x84f   : > { %v3169_v54 = vpop.xlane.xlu0 %3168 }
 0x850   : > { %v3173_v49 = vmul.f32 0.03125, %v3169_v54 }
 0x851   : > { %v3172_v51 = vpop.xlane.xlu1 %3171 }
 0x852   : > { %v3175_v62 = vadd.f32 1e-05, %v3173_v49  ;;  %v3174_v0 = vmul.f32 0.03125, %v3172_v51 }
 0x854   : > { %4081 = vrsqrt.f32 %v3175_v62  ;;  %v3176_v10 = vadd.f32 1e-05, %v3174_v0 }
 0x856   : > { %4083 = vrsqrt.f32 %v3176_v10 }
 0x85e   : > { %v4082_v21 = vpop.eup %4081 }
 0x85f   : > { %v3179_v1 = vmul.f32 %v4082_v21, %v3163_v39 }
 0x860   : > { %v4084_v2 = vpop.eup %4083 }
 0x861   : > { %v3188_v4 = vmul.f32 %v3690_v58, %v3179_v1  ;;  %v3180_v5 = vmul.f32 %v4084_v2, %v3164_v42 }
 0x863   : > { %v3189_v7 = vmul.f32 %v3690_v58, %v3180_v5  ;;  %v3197_v8 = vadd.f32 %v3691_v6, %v3188_v4 }
 0x865   : > { %v3198_v22 = vadd.f32 %v3691_v6, %v3189_v7 }
 0x867   : > { %v3199_v59 = vpack.c.bf16 %v3198_v22, %v3197_v8 }
 0x869   : > { %3897 = vmatmul.mubr.msk.bf16.vlgmr.msra.gmra.mrb[40].mxu0 %vm865_vm2, %v3199_v59 }
 0x93c   : > { %v3260_v25 = vpop.f32.mrb[40].mxu0 }
 0x93d   : > { %v3261_v50 = vadd.f32 %v3692_v35, %v3260_v25  ;;  %v3898_v60 = vpop.f32.mrb[41].mxu0 }
 0x93e   : > { %v3263_v16 = vpop.f32.mrb[42].mxu0 }
 0x93f   : > { %v3267_v17 = vmul.f32 0.01, %v3261_v50  ;;  %v3264_v18 = vadd.f32 %v3692_v35, %v3263_v16  ;;  %v3899_v14 = vpop.f32.mrb[43].mxu0 }
 0x941   : > { %v3268_v56 = vmul.f32 0.01, %v3264_v18  ;;  %v3269_v15 = vmax.f32 %v3261_v50, %v3267_v17 }
 0x943   : > { %v3270_v19 = vmax.f32 %v3264_v18, %v3268_v56 }
 0x945   : > { %v3271_v3 = vpack.c.bf16 %v3270_v19, %v3269_v15 }
 0x947   : > { %3909 = vmatmul.mubr.msk.bf16.vlgmr.msra.gmra.mrb[40].mxu1 %vm3311_vm7, %v3271_v3 }
 0xa1a   : > { %v3349_v57 = vpop.f32.mrb[40].mxu1 }
 0xa1b   : > { %v3350_v20 = vadd.f32 %v3696_v63, %v3349_v57  ;;  %v3910_v23 = vpop.f32.mrb[41].mxu1 }
 0xa1c   : > { %v3352_v26 = vpop.f32.mrb[42].mxu1 }
 0xa1d   : > { %v3356_v61 = vadd.f32 %v3350_v20, %v3197_v8  ;;  %v3353_v12 = vadd.f32 %v3696_v63, %v3352_v26  ;;  %v3911_v13 = vpop.f32.mrb[43].mxu1 }
 0xa1f   : > { %3358 = vst.msk [vmem:[#allocation13] sm:$0xff] %vm865_vm2, %v3356_v61  ;;  %v3357_v24 = vadd.f32 %v3353_v12, %v3198_v22 }
 0xa21   : > { %3359 = vst.msk [vmem:[#allocation13 + $0x8] sm:$0xff] %vm865_vm2, %v3357_v24 }
 0xa22   : > { %4278 = shalt.err (!%p4275_p5)
}
 0xa23   : > { %s5368_s16 = sld [smem:[#allocation39_spill]] }
 0xa29   : > { %s4279_s23 = scalar_lea.hbm %s5368_s16, 256 }
 0xa2a   : > { %p4280_p12 = scmp.ne.s32.totalorder %s5368_s16, %s4279_s23  ;;  %p4285_p2 = scmp.lt.u32.totalorder %s4279_s23, %s5368_s16 }
 0xa2c   : > { %p4281_p11 = pnand %p4280_p12, %p3953_p6 }
 0xa2e   : > { %p4282_p13 = pneg %p4281_p11 }
 0xa30   : > { %p4287_p10 = pnand %p4285_p2, %p4282_p13 }
 0xa32   : > { %4290 = shalt.err (!%p4287_p10)
}
 0xa33   : > { %s4380_s5 = smov 128  }
 0xa34   : > { %3927 = dma.vmem_to_hbm [thread:$0]  (%p3953_p6), %s3370_s12, 256, %s5368_s16, [#allocation4], %s4380_s5, %s4380_s5, %s4377_s25  }
 0xa35   : > { %4332 = dma.done.wait (%p3953_p6), [#allocation4], 256  }
 0xa36   : > { %4334 = vsyncadd (%p3953_p6), [#allocation4], 4294967040 }
 0xa37 PF: > { %s5369_s27 = sld [smem:[#allocation22_spill]]  ;;  %s5370_s18 = sld [smem:[#allocation19_spill]] }
 0xa38   : > { %s5371_s19 = sld [smem:[#allocation20_spill]]  ;;  %s5372_s20 = sld [smem:[#allocation24_spill]] }
 0xa39   : > { %s5373_s21 = sld [smem:[#allocation21_spill]]  ;;  %s5374_s22 = sld [smem:[#allocation23_spill]] }
 0xa3d   : > { %s36_s23 = sadd.s32 1, %s5369_s27  }
 0xa3e   : > { %p33_p1 = scmp.ge.s32.totalorder %s36_s23, 4  }
 0xa40   :  { %35 = sbr.rel (!%p33_p1) target bundleno = 26 (0x1a), region = 203 }
 0xa47   :  { %3385 = vsyncpa [#allocation3], 1 }
 0xa48   :  { %3387 = vsyncpa [#allocation3 + $0x1], 1 }
 0xa49   :  { %3388 = vsyncpa [#allocation6], 1 }
 0xa4a   :  { %3390 = vsyncpa [#allocation6 + $0x1], 1 }
 0xa4b   :  { %3391 = vsyncpa [#allocation9], 1 }
 0xa4c   :  { %3393 = vsyncpa [#allocation9 + $0x1], 1 }
 0xa4d   :  { %3394 = vsyncpa [#allocation12], 1 }
 0xa4e   :  { %3396 = vsyncpa [#allocation12 + $0x1], 1 }
 0xa4f   :  { %3397 = vsyncpa [#allocation4], 1 }
 0xa50   :  { %3399 = vsyncpa [#allocation4 + $0x1], 1 }

</bundles_post_ra>
